<compile_context>
chip_gen: v7x
topology: tpu7x:2x2x1
jax: 0.10.0
libtpu: 0.0.40
codegen_flags: <defaults>
</compile_context>

<pallas_src>
import functools

import jax
import jax.numpy as jnp
from jax import lax
from jax.experimental import pallas as pl
from jax.experimental.pallas import tpu as pltpu

_EPS = 1e-5  # nn.BatchNorm2d default eps


# ---------------------------------------------------------------------------
# fused kernel
# ---------------------------------------------------------------------------
def _resblock_kernel(x_ref, wf1_ref, wf2_ref, g1_ref, be1_ref, g2_ref, be2_ref,
                     mask_ref, out_ref, hbuf_ref, m_ref,
                     *, C, P, Wp, M0, inv_cnt):
    """Layout: flat padded pixel index p = n*Hp*Wp + y*Wp + x sits at lane
    column M0 + p.  Valid image data lives at y<H, x<W; everything else
    (including the front margin of width M0 = Wp+1) is zero, so a 3x3 tap
    (dy, dx) is just the lane-shifted slice starting at M0 + (dy-1)*Wp+(dx-1).
    """
    mask = mask_ref[...]                                   # (1, P) valid-pixel mask

    def gather_taps(src_ref):
        # Stack the 9 lane-shifted tap views into m_ref -> (9*C, P).
        for t in range(9):
            dy, dx = t // 3, t % 3
            s = (dy - 1) * Wp + (dx - 1)
            m_ref[t * C:(t + 1) * C, :] = src_ref[:, M0 + s:M0 + s + P]

    def conv_bn(w_ref, g_ref, b_ref):
        # one MXU matmul: (C, 9C) @ (9C, P) -> (C, P)
        y = jnp.dot(w_ref[...], m_ref[...],
                    preferred_element_type=jnp.float32)
        # one-pass biased batch stats over the valid pixels only
        ym = y * mask
        s1 = jnp.sum(ym, axis=1, keepdims=True)            # (C, 1)
        s2 = jnp.sum(ym * y, axis=1, keepdims=True)        # (C, 1)
        mean = s1 * inv_cnt
        var = s2 * inv_cnt - mean * mean
        scale = g_ref[...] * lax.rsqrt(var + _EPS)          # (C, 1)
        shift = b_ref[...] - mean * scale
        return y * scale + shift

    # ---- stage 1: h = relu(bn1(conv1(x))) ---------------------------------
    gather_taps(x_ref)
    h = jnp.maximum(conv_bn(wf1_ref, g1_ref, be1_ref), 0.0) * mask

    # keep h in VMEM, re-padded into the flat layout (never touches HBM)
    hbuf_ref[...] = jnp.zeros_like(hbuf_ref)
    hbuf_ref[:, M0:M0 + P] = h

    # ---- stage 2: relu(bn2(conv2(h)) + x) ---------------------------------
    gather_taps(hbuf_ref)
    y2 = conv_bn(wf2_ref, g2_ref, be2_ref)
    out_ref[...] = jnp.maximum(y2 + x_ref[:, M0:M0 + P], 0.0)


# ---------------------------------------------------------------------------
# wrapper (plain-JAX glue: layout plumbing only)
# ---------------------------------------------------------------------------
def resblock_forward(x_nchw, params):
    w1, _b1, g1, be1, w2, _b2, g2, be2 = params   # conv biases cancelled by BN
    N, C, H, W = x_nchw.shape
    Hp, Wp = H + 2, W + 2
    P = N * Hp * Wp                 # flat padded pixel count
    M0 = Wp + 1                     # front margin >= largest negative tap shift
    Pe = ((M0 + P + M0 + 127) // 128) * 128   # lane-padded buffer width

    # --- layout plumbing: NCHW -> (C, flat padded pixels), single copy -----
    xt = jnp.transpose(x_nchw, (1, 0, 2, 3)).astype(jnp.float32)   # (C,N,H,W)
    xt = jnp.pad(xt, ((0, 0), (0, 0), (0, 2), (0, 2)))             # (C,N,Hp,Wp)
    x_flat = jnp.pad(xt.reshape(C, P), ((0, 0), (M0, Pe - M0 - P)))  # (C, Pe)

    # torch conv weight (Cout,Cin,3,3) -> (Cout, 9*Cin), tap-major, ci-minor
    def wf(w):
        return jnp.transpose(w, (0, 2, 3, 1)).reshape(C, 9 * C).astype(jnp.float32)

    def col(v):
        return v.reshape(C, 1).astype(jnp.float32)

    # valid-pixel mask in the flat padded layout
    valid = (jnp.arange(Hp) < H)[:, None] & (jnp.arange(Wp) < W)[None, :]
    mask = jnp.tile(valid.reshape(-1), N).reshape(1, P).astype(jnp.float32)

    kernel = functools.partial(_resblock_kernel, C=C, P=P, Wp=Wp, M0=M0,
                               inv_cnt=1.0 / float(N * H * W))
    vmem = pl.BlockSpec(memory_space=pltpu.MemorySpace.VMEM)

    out_flat = pl.pallas_call(
        kernel,
        out_shape=jax.ShapeDtypeStruct((C, P), jnp.float32),
        in_specs=[vmem] * 8,
        out_specs=vmem,
        scratch_shapes=[
            pltpu.VMEM((C, Pe), jnp.float32),       # padded intermediate h
            pltpu.VMEM((9 * C, P), jnp.float32),    # stacked conv taps (im2col^T)
        ],
    )(x_flat, wf(w1), wf(w2), col(g1), col(be1), col(g2), col(be2), mask)

    # unflatten: (C, N*Hp*Wp) -> (N, C, H, W)
    out = out_flat.reshape(C, N, Hp, Wp)[:, :, :H, :W]
    return jnp.transpose(out, (1, 0, 2, 3))


# ---------------------------------------------------------------------------
# pure-JAX reference (faithful to the PyTorch module, incl. conv bias)
# ---------------------------------------------------------------------------
def resblock_reference(x_nchw, params):
    w1, b1, g1, be1, w2, b2, g2, be2 = params
    x = jnp.transpose(x_nchw, (0, 2, 3, 1))

    def conv(y, w, b):
        return lax.conv_general_dilated(
            y, jnp.transpose(w, (2, 3, 1, 0)), (1, 1), 'SAME',
            dimension_numbers=('NHWC', 'HWIO', 'NHWC')) + b.reshape(1, 1, 1, -1)

    def bn(y, g, be):
        m = jnp.mean(y, axis=(0, 1, 2), keepdims=True)
        v = jnp.mean(jnp.square(y - m), axis=(0, 1, 2), keepdims=True)
        return (g.reshape(1, 1, 1, -1) * (y - m) * lax.rsqrt(v + _EPS)
                + be.reshape(1, 1, 1, -1))

    h = jax.nn.relu(bn(conv(x, w1, b1), g1, be1))
    h = bn(conv(h, w2, b2), g2, be2) + x
    return jnp.transpose(jax.nn.relu(h), (0, 3, 1, 2))


# ---------------------------------------------------------------------------
if __name__ == "__main__":
    key = jax.random.PRNGKey(0)
    N, C, H, W = 2, 4, 16, 16          # batch=2, filter_size=4, 16x16 board
    ks = jax.random.split(key, 5)
    x = jax.random.normal(ks[0], (N, C, H, W), jnp.float32)

    fan_in = C * 3 * 3
    w1 = jax.random.normal(ks[1], (C, C, 3, 3), jnp.float32) / jnp.sqrt(fan_in)
    b1 = 0.01 * jax.random.normal(ks[2], (C,), jnp.float32)
    w2 = jax.random.normal(ks[3], (C, C, 3, 3), jnp.float32) / jnp.sqrt(fan_in)
    b2 = 0.01 * jax.random.normal(ks[4], (C,), jnp.float32)
    g1, be1 = jnp.ones((C,), jnp.float32), jnp.zeros((C,), jnp.float32)
    g2, be2 = jnp.ones((C,), jnp.float32), jnp.zeros((C,), jnp.float32)
    params = (w1, b1, g1, be1, w2, b2, g2, be2)

    out = jax.block_until_ready(resblock_forward(x, params))
    ref = jax.block_until_ready(resblock_reference(x, params))

    assert out.shape == (N, C, H, W) and out.dtype == jnp.float32
    err = float(jnp.max(jnp.abs(out - ref)))
    assert err < 5e-4, "max abs diff = %g" % err
    print("KERNEL_OK")
</pallas_src>

<mosaic_0001>
module attributes {stable_mosaic.version = 11 : i64} {
  func.func @_resblock_kernel(%arg0: memref<4x768xf32, #tpu.memory_space<vmem>>, %arg1: memref<4x36xf32, #tpu.memory_space<vmem>>, %arg2: memref<4x36xf32, #tpu.memory_space<vmem>>, %arg3: memref<4x1xf32, #tpu.memory_space<vmem>>, %arg4: memref<4x1xf32, #tpu.memory_space<vmem>>, %arg5: memref<4x1xf32, #tpu.memory_space<vmem>>, %arg6: memref<4x1xf32, #tpu.memory_space<vmem>>, %arg7: memref<1x648xf32, #tpu.memory_space<vmem>>, %arg8: memref<4x648xf32, #tpu.memory_space<vmem>>, %arg9: memref<4x768xf32, #tpu.memory_space<vmem>>, %arg10: memref<36x648xf32, #tpu.memory_space<vmem>>) attributes {dimension_semantics = [], scalar_prefetch = 0 : i64, scratch_operands = 2 : i64, tpu.core_type = #tpu.core_type<tc>} {
    %c0 = arith.constant 0 : index
    %c0_0 = arith.constant 0 : index
    %0 = vector.load %arg7[%c0, %c0_0] : memref<1x648xf32, #tpu.memory_space<vmem>>, vector<1x648xf32>
    %c0_1 = arith.constant 0 : index
    %c0_2 = arith.constant 0 : index
    %1 = vector.load %arg0[%c0_1, %c0_2] : memref<4x768xf32, #tpu.memory_space<vmem>>, vector<4x648xf32>
    %c0_3 = arith.constant 0 : index
    %c0_4 = arith.constant 0 : index
    %2 = vector.load %arg10[%c0_3, %c0_4] : memref<36x648xf32, #tpu.memory_space<vmem>>, vector<4x648xf32>
    tpu.vector_store %arg10[%c0_3, %c0_4], %1 {strides = array<i32>} : memref<36x648xf32, #tpu.memory_space<vmem>>, vector<4x648xf32>,
    %c0_5 = arith.constant 0 : index
    %c1 = arith.constant 1 : index
    %3 = vector.load %arg0[%c0_5, %c1] : memref<4x768xf32, #tpu.memory_space<vmem>>, vector<4x648xf32>
    %c4 = arith.constant 4 : index
    %c0_6 = arith.constant 0 : index
    %4 = vector.load %arg10[%c4, %c0_6] : memref<36x648xf32, #tpu.memory_space<vmem>>, vector<4x648xf32>
    tpu.vector_store %arg10[%c4, %c0_6], %3 {strides = array<i32>} : memref<36x648xf32, #tpu.memory_space<vmem>>, vector<4x648xf32>,
    %c0_7 = arith.constant 0 : index
    %c2 = arith.constant 2 : index
    %5 = vector.load %arg0[%c0_7, %c2] : memref<4x768xf32, #tpu.memory_space<vmem>>, vector<4x648xf32>
    %c8 = arith.constant 8 : index
    %c0_8 = arith.constant 0 : index
    %6 = vector.load %arg10[%c8, %c0_8] : memref<36x648xf32, #tpu.memory_space<vmem>>, vector<4x648xf32>
    tpu.vector_store %arg10[%c8, %c0_8], %5 {strides = array<i32>} : memref<36x648xf32, #tpu.memory_space<vmem>>, vector<4x648xf32>,
    %c0_9 = arith.constant 0 : index
    %c18 = arith.constant 18 : index
    %7 = vector.load %arg0[%c0_9, %c18] : memref<4x768xf32, #tpu.memory_space<vmem>>, vector<4x648xf32>
    %c12 = arith.constant 12 : index
    %c0_10 = arith.constant 0 : index
    %8 = vector.load %arg10[%c12, %c0_10] : memref<36x648xf32, #tpu.memory_space<vmem>>, vector<4x648xf32>
    tpu.vector_store %arg10[%c12, %c0_10], %7 {strides = array<i32>} : memref<36x648xf32, #tpu.memory_space<vmem>>, vector<4x648xf32>,
    %c0_11 = arith.constant 0 : index
    %c19 = arith.constant 19 : index
    %9 = vector.load %arg0[%c0_11, %c19] : memref<4x768xf32, #tpu.memory_space<vmem>>, vector<4x648xf32>
    %c16 = arith.constant 16 : index
    %c0_12 = arith.constant 0 : index
    %10 = vector.load %arg10[%c16, %c0_12] : memref<36x648xf32, #tpu.memory_space<vmem>>, vector<4x648xf32>
    tpu.vector_store %arg10[%c16, %c0_12], %9 {strides = array<i32>} : memref<36x648xf32, #tpu.memory_space<vmem>>, vector<4x648xf32>,
    %c0_13 = arith.constant 0 : index
    %c20 = arith.constant 20 : index
    %11 = vector.load %arg0[%c0_13, %c20] : memref<4x768xf32, #tpu.memory_space<vmem>>, vector<4x648xf32>
    %c20_14 = arith.constant 20 : index
    %c0_15 = arith.constant 0 : index
    %12 = vector.load %arg10[%c20_14, %c0_15] : memref<36x648xf32, #tpu.memory_space<vmem>>, vector<4x648xf32>
    tpu.vector_store %arg10[%c20_14, %c0_15], %11 {strides = array<i32>} : memref<36x648xf32, #tpu.memory_space<vmem>>, vector<4x648xf32>,
    %c0_16 = arith.constant 0 : index
    %c36 = arith.constant 36 : index
    %13 = vector.load %arg0[%c0_16, %c36] : memref<4x768xf32, #tpu.memory_space<vmem>>, vector<4x648xf32>
    %c24 = arith.constant 24 : index
    %c0_17 = arith.constant 0 : index
    %14 = vector.load %arg10[%c24, %c0_17] : memref<36x648xf32, #tpu.memory_space<vmem>>, vector<4x648xf32>
    tpu.vector_store %arg10[%c24, %c0_17], %13 {strides = array<i32>} : memref<36x648xf32, #tpu.memory_space<vmem>>, vector<4x648xf32>,
    %c0_18 = arith.constant 0 : index
    %c37 = arith.constant 37 : index
    %15 = vector.load %arg0[%c0_18, %c37] : memref<4x768xf32, #tpu.memory_space<vmem>>, vector<4x648xf32>
    %c28 = arith.constant 28 : index
    %c0_19 = arith.constant 0 : index
    %16 = vector.load %arg10[%c28, %c0_19] : memref<36x648xf32, #tpu.memory_space<vmem>>, vector<4x648xf32>
    tpu.vector_store %arg10[%c28, %c0_19], %15 {strides = array<i32>} : memref<36x648xf32, #tpu.memory_space<vmem>>, vector<4x648xf32>,
    %c0_20 = arith.constant 0 : index
    %c38 = arith.constant 38 : index
    %17 = vector.load %arg0[%c0_20, %c38] : memref<4x768xf32, #tpu.memory_space<vmem>>, vector<4x648xf32>
    %c32 = arith.constant 32 : index
    %c0_21 = arith.constant 0 : index
    %18 = vector.load %arg10[%c32, %c0_21] : memref<36x648xf32, #tpu.memory_space<vmem>>, vector<4x648xf32>
    tpu.vector_store %arg10[%c32, %c0_21], %17 {strides = array<i32>} : memref<36x648xf32, #tpu.memory_space<vmem>>, vector<4x648xf32>,
    %c0_22 = arith.constant 0 : index
    %c0_23 = arith.constant 0 : index
    %19 = vector.load %arg1[%c0_22, %c0_23] : memref<4x36xf32, #tpu.memory_space<vmem>>, vector<4x36xf32>
    %c0_24 = arith.constant 0 : index
    %c0_25 = arith.constant 0 : index
    %20 = vector.load %arg10[%c0_24, %c0_25] : memref<36x648xf32, #tpu.memory_space<vmem>>, vector<36x648xf32>
    %cst = arith.constant dense<0.000000e+00> : vector<4x648xf32>
    %21 = tpu.matmul %19, %20, %cst {dimension_numbers = #tpu.dot_dimension_numbers<[1], [0], [0], [1], [0, 0, 1, 1], [], []>} : vector<4x36xf32>, vector<36x648xf32>, vector<4x648xf32> -> vector<4x648xf32>
    %22 = vector.broadcast %0 : vector<1x648xf32> to vector<4x648xf32>
    %23 = arith.mulf %21, %22 : vector<4x648xf32>
    %cst_26 = arith.constant dense<0.000000e+00> : vector<4xf32>
    %24 = vector.multi_reduction <add>, %23, %cst_26 [1] : vector<4x648xf32> to vector<4xf32>
    %25 = vector.shape_cast %24 : vector<4xf32> to vector<4x1xf32>
    %26 = arith.mulf %23, %21 : vector<4x648xf32>
    %cst_27 = arith.constant dense<0.000000e+00> : vector<4xf32>
    %27 = vector.multi_reduction <add>, %26, %cst_27 [1] : vector<4x648xf32> to vector<4xf32>
    %28 = vector.shape_cast %27 : vector<4xf32> to vector<4x1xf32>
    %cst_28 = arith.constant 0.001953125 : f32
    %29 = vector.broadcast %cst_28 : f32 to vector<4x1xf32>
    %30 = arith.mulf %25, %29 : vector<4x1xf32>
    %cst_29 = arith.constant 0.001953125 : f32
    %31 = vector.broadcast %cst_29 : f32 to vector<4x1xf32>
    %32 = arith.mulf %28, %31 : vector<4x1xf32>
    %33 = arith.mulf %30, %30 : vector<4x1xf32>
    %34 = arith.subf %32, %33 : vector<4x1xf32>
    %c0_30 = arith.constant 0 : index
    %c0_31 = arith.constant 0 : index
    %35 = vector.load %arg3[%c0_30, %c0_31] : memref<4x1xf32, #tpu.memory_space<vmem>>, vector<4x1xf32>
    %cst_32 = arith.constant 9.99999974E-6 : f32
    %36 = vector.broadcast %cst_32 : f32 to vector<4x1xf32>
    %37 = arith.addf %34, %36 : vector<4x1xf32>
    %38 = math.rsqrt %37 : vector<4x1xf32>
    %39 = arith.mulf %35, %38 : vector<4x1xf32>
    %c0_33 = arith.constant 0 : index
    %c0_34 = arith.constant 0 : index
    %40 = vector.load %arg4[%c0_33, %c0_34] : memref<4x1xf32, #tpu.memory_space<vmem>>, vector<4x1xf32>
    %41 = arith.mulf %30, %39 : vector<4x1xf32>
    %42 = arith.subf %40, %41 : vector<4x1xf32>
    %43 = vector.broadcast %39 : vector<4x1xf32> to vector<4x648xf32>
    %44 = arith.mulf %21, %43 : vector<4x648xf32>
    %45 = vector.broadcast %42 : vector<4x1xf32> to vector<4x648xf32>
    %46 = arith.addf %44, %45 : vector<4x648xf32>
    %cst_35 = arith.constant 0.000000e+00 : f32
    %47 = vector.broadcast %cst_35 : f32 to vector<4x648xf32>
    %48 = arith.maximumf %46, %47 : vector<4x648xf32>
    %49 = vector.broadcast %0 : vector<1x648xf32> to vector<4x648xf32>
    %50 = arith.mulf %48, %49 : vector<4x648xf32>
    %cst_36 = arith.constant 0.000000e+00 : f32
    %51 = vector.broadcast %cst_36 : f32 to vector<4x768xf32>
    %c0_37 = arith.constant 0 : index
    %c0_38 = arith.constant 0 : index
    %52 = vector.load %arg9[%c0_37, %c0_38] : memref<4x768xf32, #tpu.memory_space<vmem>>, vector<4x768xf32>
    tpu.vector_store %arg9[%c0_37, %c0_38], %51 {strides = array<i32>} : memref<4x768xf32, #tpu.memory_space<vmem>>, vector<4x768xf32>,
    %c0_39 = arith.constant 0 : index
    %c19_40 = arith.constant 19 : index
    %53 = vector.load %arg9[%c0_39, %c19_40] : memref<4x768xf32, #tpu.memory_space<vmem>>, vector<4x648xf32>
    tpu.vector_store %arg9[%c0_39, %c19_40], %50 {strides = array<i32>} : memref<4x768xf32, #tpu.memory_space<vmem>>, vector<4x648xf32>,
    %c0_41 = arith.constant 0 : index
    %c0_42 = arith.constant 0 : index
    %54 = vector.load %arg9[%c0_41, %c0_42] : memref<4x768xf32, #tpu.memory_space<vmem>>, vector<4x648xf32>
    %c0_43 = arith.constant 0 : index
    %c0_44 = arith.constant 0 : index
    %55 = vector.load %arg10[%c0_43, %c0_44] : memref<36x648xf32, #tpu.memory_space<vmem>>, vector<4x648xf32>
    tpu.vector_store %arg10[%c0_43, %c0_44], %54 {strides = array<i32>} : memref<36x648xf32, #tpu.memory_space<vmem>>, vector<4x648xf32>,
    %c0_45 = arith.constant 0 : index
    %c1_46 = arith.constant 1 : index
    %56 = vector.load %arg9[%c0_45, %c1_46] : memref<4x768xf32, #tpu.memory_space<vmem>>, vector<4x648xf32>
    %c4_47 = arith.constant 4 : index
    %c0_48 = arith.constant 0 : index
    %57 = vector.load %arg10[%c4_47, %c0_48] : memref<36x648xf32, #tpu.memory_space<vmem>>, vector<4x648xf32>
    tpu.vector_store %arg10[%c4_47, %c0_48], %56 {strides = array<i32>} : memref<36x648xf32, #tpu.memory_space<vmem>>, vector<4x648xf32>,
    %c0_49 = arith.constant 0 : index
    %c2_50 = arith.constant 2 : index
    %58 = vector.load %arg9[%c0_49, %c2_50] : memref<4x768xf32, #tpu.memory_space<vmem>>, vector<4x648xf32>
    %c8_51 = arith.constant 8 : index
    %c0_52 = arith.constant 0 : index
    %59 = vector.load %arg10[%c8_51, %c0_52] : memref<36x648xf32, #tpu.memory_space<vmem>>, vector<4x648xf32>
    tpu.vector_store %arg10[%c8_51, %c0_52], %58 {strides = array<i32>} : memref<36x648xf32, #tpu.memory_space<vmem>>, vector<4x648xf32>,
    %c0_53 = arith.constant 0 : index
    %c18_54 = arith.constant 18 : index
    %60 = vector.load %arg9[%c0_53, %c18_54] : memref<4x768xf32, #tpu.memory_space<vmem>>, vector<4x648xf32>
    %c12_55 = arith.constant 12 : index
    %c0_56 = arith.constant 0 : index
    %61 = vector.load %arg10[%c12_55, %c0_56] : memref<36x648xf32, #tpu.memory_space<vmem>>, vector<4x648xf32>
    tpu.vector_store %arg10[%c12_55, %c0_56], %60 {strides = array<i32>} : memref<36x648xf32, #tpu.memory_space<vmem>>, vector<4x648xf32>,
    %c0_57 = arith.constant 0 : index
    %c19_58 = arith.constant 19 : index
    %62 = vector.load %arg9[%c0_57, %c19_58] : memref<4x768xf32, #tpu.memory_space<vmem>>, vector<4x648xf32>
    %c16_59 = arith.constant 16 : index
    %c0_60 = arith.constant 0 : index
    %63 = vector.load %arg10[%c16_59, %c0_60] : memref<36x648xf32, #tpu.memory_space<vmem>>, vector<4x648xf32>
    tpu.vector_store %arg10[%c16_59, %c0_60], %62 {strides = array<i32>} : memref<36x648xf32, #tpu.memory_space<vmem>>, vector<4x648xf32>,
    %c0_61 = arith.constant 0 : index
    %c20_62 = arith.constant 20 : index
    %64 = vector.load %arg9[%c0_61, %c20_62] : memref<4x768xf32, #tpu.memory_space<vmem>>, vector<4x648xf32>
    %c20_63 = arith.constant 20 : index
    %c0_64 = arith.constant 0 : index
    %65 = vector.load %arg10[%c20_63, %c0_64] : memref<36x648xf32, #tpu.memory_space<vmem>>, vector<4x648xf32>
    tpu.vector_store %arg10[%c20_63, %c0_64], %64 {strides = array<i32>} : memref<36x648xf32, #tpu.memory_space<vmem>>, vector<4x648xf32>,
    %c0_65 = arith.constant 0 : index
    %c36_66 = arith.constant 36 : index
    %66 = vector.load %arg9[%c0_65, %c36_66] : memref<4x768xf32, #tpu.memory_space<vmem>>, vector<4x648xf32>
    %c24_67 = arith.constant 24 : index
    %c0_68 = arith.constant 0 : index
    %67 = vector.load %arg10[%c24_67, %c0_68] : memref<36x648xf32, #tpu.memory_space<vmem>>, vector<4x648xf32>
    tpu.vector_store %arg10[%c24_67, %c0_68], %66 {strides = array<i32>} : memref<36x648xf32, #tpu.memory_space<vmem>>, vector<4x648xf32>,
    %c0_69 = arith.constant 0 : index
    %c37_70 = arith.constant 37 : index
    %68 = vector.load %arg9[%c0_69, %c37_70] : memref<4x768xf32, #tpu.memory_space<vmem>>, vector<4x648xf32>
    %c28_71 = arith.constant 28 : index
    %c0_72 = arith.constant 0 : index
    %69 = vector.load %arg10[%c28_71, %c0_72] : memref<36x648xf32, #tpu.memory_space<vmem>>, vector<4x648xf32>
    tpu.vector_store %arg10[%c28_71, %c0_72], %68 {strides = array<i32>} : memref<36x648xf32, #tpu.memory_space<vmem>>, vector<4x648xf32>,
    %c0_73 = arith.constant 0 : index
    %c38_74 = arith.constant 38 : index
    %70 = vector.load %arg9[%c0_73, %c38_74] : memref<4x768xf32, #tpu.memory_space<vmem>>, vector<4x648xf32>
    %c32_75 = arith.constant 32 : index
    %c0_76 = arith.constant 0 : index
    %71 = vector.load %arg10[%c32_75, %c0_76] : memref<36x648xf32, #tpu.memory_space<vmem>>, vector<4x648xf32>
    tpu.vector_store %arg10[%c32_75, %c0_76], %70 {strides = array<i32>} : memref<36x648xf32, #tpu.memory_space<vmem>>, vector<4x648xf32>,
    %c0_77 = arith.constant 0 : index
    %c0_78 = arith.constant 0 : index
    %72 = vector.load %arg2[%c0_77, %c0_78] : memref<4x36xf32, #tpu.memory_space<vmem>>, vector<4x36xf32>
    %c0_79 = arith.constant 0 : index
    %c0_80 = arith.constant 0 : index
    %73 = vector.load %arg10[%c0_79, %c0_80] : memref<36x648xf32, #tpu.memory_space<vmem>>, vector<36x648xf32>
    %cst_81 = arith.constant dense<0.000000e+00> : vector<4x648xf32>
    %74 = tpu.matmul %72, %73, %cst_81 {dimension_numbers = #tpu.dot_dimension_numbers<[1], [0], [0], [1], [0, 0, 1, 1], [], []>} : vector<4x36xf32>, vector<36x648xf32>, vector<4x648xf32> -> vector<4x648xf32>
    %75 = vector.broadcast %0 : vector<1x648xf32> to vector<4x648xf32>
    %76 = arith.mulf %74, %75 : vector<4x648xf32>
    %cst_82 = arith.constant dense<0.000000e+00> : vector<4xf32>
    %77 = vector.multi_reduction <add>, %76, %cst_82 [1] : vector<4x648xf32> to vector<4xf32>
    %78 = vector.shape_cast %77 : vector<4xf32> to vector<4x1xf32>
    %79 = arith.mulf %76, %74 : vector<4x648xf32>
    %cst_83 = arith.constant dense<0.000000e+00> : vector<4xf32>
    %80 = vector.multi_reduction <add>, %79, %cst_83 [1] : vector<4x648xf32> to vector<4xf32>
    %81 = vector.shape_cast %80 : vector<4xf32> to vector<4x1xf32>
    %cst_84 = arith.constant 0.001953125 : f32
    %82 = vector.broadcast %cst_84 : f32 to vector<4x1xf32>
    %83 = arith.mulf %78, %82 : vector<4x1xf32>
    %cst_85 = arith.constant 0.001953125 : f32
    %84 = vector.broadcast %cst_85 : f32 to vector<4x1xf32>
    %85 = arith.mulf %81, %84 : vector<4x1xf32>
    %86 = arith.mulf %83, %83 : vector<4x1xf32>
    %87 = arith.subf %85, %86 : vector<4x1xf32>
    %c0_86 = arith.constant 0 : index
    %c0_87 = arith.constant 0 : index
    %88 = vector.load %arg5[%c0_86, %c0_87] : memref<4x1xf32, #tpu.memory_space<vmem>>, vector<4x1xf32>
    %cst_88 = arith.constant 9.99999974E-6 : f32
    %89 = vector.broadcast %cst_88 : f32 to vector<4x1xf32>
    %90 = arith.addf %87, %89 : vector<4x1xf32>
    %91 = math.rsqrt %90 : vector<4x1xf32>
    %92 = arith.mulf %88, %91 : vector<4x1xf32>
    %c0_89 = arith.constant 0 : index
    %c0_90 = arith.constant 0 : index
    %93 = vector.load %arg6[%c0_89, %c0_90] : memref<4x1xf32, #tpu.memory_space<vmem>>, vector<4x1xf32>
    %94 = arith.mulf %83, %92 : vector<4x1xf32>
    %95 = arith.subf %93, %94 : vector<4x1xf32>
    %96 = vector.broadcast %92 : vector<4x1xf32> to vector<4x648xf32>
    %97 = arith.mulf %74, %96 : vector<4x648xf32>
    %98 = vector.broadcast %95 : vector<4x1xf32> to vector<4x648xf32>
    %99 = arith.addf %97, %98 : vector<4x648xf32>
    %c0_91 = arith.constant 0 : index
    %c19_92 = arith.constant 19 : index
    %100 = vector.load %arg0[%c0_91, %c19_92] : memref<4x768xf32, #tpu.memory_space<vmem>>, vector<4x648xf32>
    %101 = arith.addf %99, %100 : vector<4x648xf32>
    %cst_93 = arith.constant 0.000000e+00 : f32
    %102 = vector.broadcast %cst_93 : f32 to vector<4x648xf32>
    %103 = arith.maximumf %101, %102 : vector<4x648xf32>
    %c0_94 = arith.constant 0 : index
    %c0_95 = arith.constant 0 : index
    %104 = vector.load %arg8[%c0_94, %c0_95] : memref<4x648xf32, #tpu.memory_space<vmem>>, vector<4x648xf32>
    tpu.vector_store %arg8[%c0_94, %c0_95], %103 {strides = array<i32>} : memref<4x648xf32, #tpu.memory_space<vmem>>, vector<4x648xf32>,
    return
  }
}

</mosaic_0001>

<bundles_post_ra>
// kernel: tpu_custom_call.1
= control target key start
LH: loop header
LB: loop body
LE: loop exit
PB: predicated region body
PF: predicated region fallthrough
CT: control target
= control target key end

     0   :  { %13 = vsyncpa [#allocation5], 0  ;;  %s2220_s0 = inlined_call_operand.hbm [shape: f32[4,768], index: 0, kind: input, shape index: {}]   ;;  %s2221_s1 = inlined_call_operand.vmem [shape: f32[4,36], index: 1, kind: input, shape index: {}]   ;;  %s2222_s2 = inlined_call_operand.vmem [shape: f32[4,36], index: 2, kind: input, shape index: {}]   ;;  %s2223_s3 = inlined_call_operand.vmem [shape: f32[4,1], index: 3, kind: input, shape index: {}]   ;;  %s2224_s4 = inlined_call_operand.vmem [shape: f32[4,1], index: 4, kind: input, shape index: {}]   ;;  %s2225_s5 = inlined_call_operand.vmem [shape: f32[4,1], index: 5, kind: input, shape index: {}]   ;;  %s2226_s6 = inlined_call_operand.vmem [shape: f32[4,1], index: 6, kind: input, shape index: {}]   ;;  %s2227_s7 = inlined_call_operand.vmem [shape: f32[1,648], index: 7, kind: input, shape index: {}]   ;;  %s2228_s8 = inlined_call_operand.hbm [shape: f32[4,648], index: 8, kind: output, shape index: {}]  }
   0x1   :  { %14 = vsyncpa [#allocation6], 0  ;;  %s1671_s27 = smov [#allocation4]   ;;  %s1623_s9 = scalar_lea.hbm %s2220_s0, 384 }
   0x2   :  { %s21_s28 = sshll.u32 %s1671_s27, 4  ;;  %p1624_p0 = scmp.ne.s32.totalorder %s2220_s0, %s1623_s9  ;;  %s22_s28 = int_to_ptr.vmem [resolvable:$true] %s21_s28 }
   0x3   :  { %p1627_p1 = scmp.lt.u32.totalorder %s1623_s9, %s2220_s0 }
   0x5   :  { %p1629_p2 = pnand %p1627_p1, %p1624_p0 }
   0x7   :  { %1632 = shalt.err (!%p1629_p2)
}
   0x8   :  { %s1633_s14 = scalar_lea.vmem %s22_s28, 384  ;;  %p1638_p4 = scmp.lt.s32.totalorder %s22_s28, %s22_s28 }
   0x9   :  { %p1634_p3 = scmp.ne.s32.totalorder %s22_s28, %s1633_s14  ;;  %p1639_p5 = scmp.lt.s32.totalorder %s1633_s14, %s1633_s14 }
   0xb   :  { %p1640_p6 = por %p1639_p5, %p1638_p4 }
   0xd   :  { %p1641_p7 = pnand %p1640_p6, %p1634_p3 }
   0xf   :  { %1644 = shalt.err (!%p1641_p7)
}
  0x10   :  { %24 = dma.hbm_to_vmem [thread:$0]  %s2220_s0, 384, %s22_s28, [#allocation5]  }
  0x11   :  { %1667 = dma.done.wait [#allocation5], 384  }
  0x12   :  { %1668 = vsyncadd [#allocation5], 4294966912  ;;  %v103_v0 = vld [vmem:[#allocation4 + $0x8] sm:$0xff]  ;;  %v1741_v1 = vld [vmem:[#allocation4] sm:$0xff]  ;;  %s1672_s17 = smov 126   ;;  %s1673_s18 = smov 127  }
  0x13   :  { %v1743_v2 = vld [vmem:[#allocation4 + $0x10] sm:$0xff]  ;;  %115 = vrot.lane.b32.xlu1 %v103_v0, %s1672_s17  ;;  %v1746_v3 = vcombine.high %v103_v0, %v103_v0  ;;  %73 = vrot.lane.b32.xlu0 %v1741_v1, %s1673_s18  ;;  %v108_v4 = vcombine.high %v1741_v1, %v1741_v1  ;;  %55 = vst [vmem:[#allocation3] sm:$0xf] %v1741_v1  ;;  %57 = vst [vmem:[#allocation3 + $0x10] sm:$0xf] %v103_v0  ;;  %s1674_s0 = smov 110  }
  0x14   :  { %59 = vst [vmem:[#allocation3 + $0x20] sm:$0xf] %v1743_v2  ;;  %v148_v5 = vcombine.low %v103_v0, %v103_v0  ;;  %v68_v6 = vcombine.low %v1741_v1, %v1741_v1  ;;  %s1675_s19 = smov 109   ;;  %s1676_s20 = smov 108   ;;  %v70_v7 = vcombine.low %v1743_v2, %v1743_v2  ;;  %v110_v8 = vcombine.high %v1743_v2, %v1743_v2 }
  0x15   :  { %56 = vst [vmem:[#allocation3 + $0x8] sm:$0xf] %v108_v4  ;;  %58 = vst [vmem:[#allocation3 + $0x18] sm:$0xf] %v1746_v3  ;;  %s1677_s21 = smov 92   ;;  %s1678_s22 = smov 91  }
  0x16   :  { %vm60_vm0 = vcmask 60416   ;;  %s1679_s23 = smov 90   ;;  %v1680_v9 = vmov 0.0   ;;  %vm123_vm1 = vcmask 1031168   ;;  %vm162_vm2 = vcmask 900096  }
  0x17   :  { %113 = vrot.lane.b32.xlu1 %v108_v4, %s1672_s17  ;;  %152 = vrot.lane.b32.xlu0 %v1741_v1, %s1674_s0  ;;  %61 = vst.msk [vmem:[#allocation3 + $0x28] sm:$0xf] %vm60_vm0, %v110_v8  ;;  %756 = vst [vmem:[#allocation2] sm:$0xff] %v1680_v9  ;;  %vm83_vm3 = vcmask 1039360   ;;  %vm201_vm4 = vcmask 891904   ;;  %vm240_vm5 = vcmask 883712  }
  0x18   :  { %493 = vmatprep.mubr.f32.mxu0 %v1680_v9  ;;  %758 = vst [vmem:[#allocation2 + $0x10] sm:$0xff] %v1680_v9  ;;  %564 = vmatprep.mubr.f32.mxu1 %v1680_v9  ;;  %vm279_vm6 = vcmask 752640   ;;  %vm2230_vm7 = vcmask 744448   ;;  %vm100_vm8 = vcmask 64516   ;;  %vm357_vm9 = vcmask 736256  }
  0x19   :  { %vm410_vm10 = vcmask 1043456   ;;  %vm2229_vm11 = vcmask 293888   ;;  %vm786_vm12 = vcmask 1043608   ;;  %vm787_vm13 = vcmask 1047556  }
  0x1a   :  { %vm777_vm14 = vcmask 154624   ;;  %vm788_vm15 = vmor %vm787_vm13, %vm786_vm12 }
  0x1b   :  { %154 = vrot.lane.b32.xlu1 %v148_v5, %s1674_s0  ;;  %75 = vrot.lane.b32.xlu0 %v148_v5, %s1673_s18 }
  0x1f   :  { %111 = vrot.lane.b32.xlu1 %v1741_v1, %s1672_s17  ;;  %71 = vrot.lane.b32.xlu0 %v68_v6, %s1673_s18 }
  0x23   :  { %191 = vrot.lane.b32.xlu1 %v108_v4, %s1675_s19  ;;  %150 = vrot.lane.b32.xlu0 %v68_v6, %s1674_s0 }
  0x27   :  { %230 = vrot.lane.b32.xlu1 %v1741_v1, %s1676_s20  ;;  %193 = vrot.lane.b32.xlu0 %v103_v0, %s1675_s19 }
  0x2b   :  { %269 = vrot.lane.b32.xlu1 %v108_v4, %s1677_s21  ;;  %232 = vrot.lane.b32.xlu0 %v148_v5, %s1676_s20 }
  0x2f   :  { %308 = vrot.lane.b32.xlu1 %v1741_v1, %s1678_s22  ;;  %271 = vrot.lane.b32.xlu0 %v103_v0, %s1677_s21 }
  0x33   :  { %189 = vrot.lane.b32.xlu1 %v1741_v1, %s1675_s19  ;;  %310 = vrot.lane.b32.xlu0 %v148_v5, %s1678_s22 }
  0x37   :  { %267 = vrot.lane.b32.xlu1 %v1741_v1, %s1677_s21  ;;  %228 = vrot.lane.b32.xlu0 %v68_v6, %s1676_s20 }
  0x3b   :  { %77 = vrot.lane.b32.xlu1 %v103_v0, %s1673_s18  ;;  %306 = vrot.lane.b32.xlu0 %v68_v6, %s1678_s22 }
  0x3f   :  { %117 = vrot.lane.b32.xlu1 %v1746_v3, %s1672_s17  ;;  %79 = vrot.lane.b32.xlu0 %v70_v7, %s1673_s18 }
  0x43   :  { %156 = vrot.lane.b32.xlu1 %v103_v0, %s1674_s0  ;;  %119 = vrot.lane.b32.xlu0 %v1743_v2, %s1672_s17 }
  0x47   :  { %195 = vrot.lane.b32.xlu1 %v1746_v3, %s1675_s19  ;;  %158 = vrot.lane.b32.xlu0 %v70_v7, %s1674_s0 }
  0x4b   :  { %234 = vrot.lane.b32.xlu1 %v103_v0, %s1676_s20  ;;  %197 = vrot.lane.b32.xlu0 %v1743_v2, %s1675_s19 }
  0x4f   :  { %273 = vrot.lane.b32.xlu1 %v1746_v3, %s1677_s21  ;;  %236 = vrot.lane.b32.xlu0 %v70_v7, %s1676_s20 }
  0x53   :  { %312 = vrot.lane.b32.xlu1 %v103_v0, %s1678_s22  ;;  %275 = vrot.lane.b32.xlu0 %v1743_v2, %s1677_s21 }
  0x57   :  { %347 = vrot.lane.b32.xlu1 %v108_v4, %s1679_s23  ;;  %314 = vrot.lane.b32.xlu0 %v70_v7, %s1678_s22 }
  0x5b   :  { %81 = vrot.lane.b32.xlu1 %v1743_v2, %s1673_s18  ;;  %349 = vrot.lane.b32.xlu0 %v103_v0, %s1679_s23 }
  0x5f   :  { %160 = vrot.lane.b32.xlu1 %v1743_v2, %s1674_s0  ;;  %121 = vrot.lane.b32.xlu0 %v110_v8, %s1672_s17 }
  0x63   :  { %199 = vrot.lane.b32.xlu1 %v110_v8, %s1675_s19  ;;  %345 = vrot.lane.b32.xlu0 %v1741_v1, %s1679_s23 }
  0x67   :  { %277 = vrot.lane.b32.xlu1 %v110_v8, %s1677_s21  ;;  %238 = vrot.lane.b32.xlu0 %v1743_v2, %s1676_s20 }
  0x6b   :  { %351 = vrot.lane.b32.xlu1 %v1746_v3, %s1679_s23  ;;  %316 = vrot.lane.b32.xlu0 %v1743_v2, %s1678_s22 }
  0x6f   :  { %355 = vrot.lane.b32.xlu1 %v110_v8, %s1679_s23  ;;  %353 = vrot.lane.b32.xlu0 %v1743_v2, %s1679_s23 }
  0x85   :  { %v1831_v10 = vpop.permute.xlu1 %115  ;;  %v74_v11 = vpop.permute.xlu0 %73 }
  0x89   :  { %v114_v12 = vpop.permute.xlu1 %113  ;;  %v153_v13 = vpop.permute.xlu0 %152 }
  0x8a   :  { %v125_v14 = vsel %vm123_vm1, %v114_v12, %v1831_v10 }
  0x8b   :  { %136 = vst [vmem:[#allocation3 + $0x38] sm:$0xf] %v125_v14 }
  0x8d   :  { %v1835_v15 = vpop.permute.xlu1 %154  ;;  %v76_v16 = vpop.permute.xlu0 %75 }
  0x8e   :  { %v164_v17 = vsel %vm162_vm2, %v153_v13, %v1835_v15  ;;  %v85_v18 = vsel %vm83_vm3, %v74_v11, %v76_v16 }
  0x8f   :  { %175 = vst [vmem:[#allocation3 + $0x38] sm:$0xf0] %v164_v17  ;;  %96 = vst [vmem:[#allocation3 + $0x8] sm:$0xf0] %v85_v18 }
  0x91   :  { %v112_v19 = vpop.permute.xlu1 %111  ;;  %v72_v20 = vpop.permute.xlu0 %71 }
  0x92   :  { %v124_v21 = vsel %vm123_vm1, %v112_v19, %v114_v12  ;;  %v84_v22 = vsel %vm83_vm3, %v72_v20, %v74_v11 }
  0x93   :  { %135 = vst [vmem:[#allocation3 + $0x30] sm:$0xf] %v124_v21  ;;  %95 = vst [vmem:[#allocation3] sm:$0xf0] %v84_v22 }
  0x95   :  { %v192_v23 = vpop.permute.xlu1 %191  ;;  %v151_v24 = vpop.permute.xlu0 %150 }
  0x96   :  { %v163_v25 = vsel %vm162_vm2, %v151_v24, %v153_v13  ;;  %v377_v26 = vld [vmem:[#allocation3 + $0x8] sm:$0xff]  ;;  %v383_v27 = vld [vmem:[#allocation3 + $0x38] sm:$0xff] }
  0x97   :  { %174 = vst [vmem:[#allocation3 + $0x30] sm:$0xf0] %v163_v25  ;;  %v1545_v28 = vpack.c.bf16 %v383_v27, %v377_v26 }
  0x99   :  { %v231_v29 = vpop.permute.xlu1 %230  ;;  %v194_v30 = vpop.permute.xlu0 %193  ;;  %1546 = vmatprep.subr.bf16.mxu0 %v1545_v28 }
  0x9a   :  { %v203_v31 = vsel %vm201_vm4, %v192_v23, %v194_v30  ;;  %v376_v35 = vld [vmem:[#allocation3] sm:$0xff] }
  0x9b   :  { %214 = vst [vmem:[#allocation3 + $0x68] sm:$0xf] %v203_v31 }
  0x9d   :  { %v270_v32 = vpop.permute.xlu1 %269  ;;  %v233_v33 = vpop.permute.xlu0 %232 }
  0x9e   :  { %v242_v34 = vsel %vm240_vm5, %v231_v29, %v233_v33  ;;  %v382_v36 = vld [vmem:[#allocation3 + $0x30] sm:$0xff] }
  0x9f   :  { %253 = vst [vmem:[#allocation3 + $0x68] sm:$0xf0] %v242_v34  ;;  %v1547_v37 = vpack.c.bf16 %v382_v36, %v376_v35 }
  0xa1   :  { %v309_v38 = vpop.permute.xlu1 %308  ;;  %v272_v39 = vpop.permute.xlu0 %271  ;;  %1548 = vmatpush1.bf16.msra.mxu0 %v1547_v37 }
  0xa2   :  { %v281_v40 = vsel %vm279_vm6, %v270_v32, %v272_v39 }
  0xa3   :  { %292 = vst [vmem:[#allocation3 + $0x98] sm:$0xf] %v281_v40 }
  0xa5   :  { %v190_v41 = vpop.permute.xlu1 %189  ;;  %v1846_v42 = vpop.permute.xlu0 %310 }
  0xa6   :  { %v202_v43 = vsel %vm201_vm4, %v190_v41, %v192_v23  ;;  %v320_v44 = vsel %vm2230_vm7, %v309_v38, %v1846_v42  ;;  %v389_v53 = vld [vmem:[#allocation3 + $0x68] sm:$0xff] }
  0xa7   :  { %213 = vst [vmem:[#allocation3 + $0x60] sm:$0xf] %v202_v43  ;;  %331 = vst [vmem:[#allocation3 + $0x98] sm:$0xf0] %v320_v44 }
  0xa9   :  { %v268_v45 = vpop.permute.xlu1 %267  ;;  %v229_v46 = vpop.permute.xlu0 %228 }
  0xaa   :  { %v280_v47 = vsel %vm279_vm6, %v268_v45, %v270_v32  ;;  %v241_v48 = vsel %vm240_vm5, %v229_v46, %v231_v29 }
  0xab   :  { %291 = vst [vmem:[#allocation3 + $0x90] sm:$0xf] %v280_v47  ;;  %252 = vst [vmem:[#allocation3 + $0x60] sm:$0xf0] %v241_v48 }
  0xad   :  { %v78_v49 = vpop.permute.xlu1 %77  ;;  %v307_v50 = vpop.permute.xlu0 %306 }
  0xae   :  { %v86_v51 = vsel %vm83_vm3, %v76_v16, %v78_v49  ;;  %v319_v52 = vsel %vm2230_vm7, %v307_v50, %v309_v38  ;;  %v395_v54 = vld [vmem:[#allocation3 + $0x98] sm:$0xff] }
  0xaf   :  { %97 = vst [vmem:[#allocation3 + $0x10] sm:$0xf0] %v86_v51  ;;  %330 = vst [vmem:[#allocation3 + $0x90] sm:$0xf0] %v319_v52  ;;  %v1549_v55 = vpack.c.bf16 %v395_v54, %v389_v53 }
  0xb1   :  { %v118_v56 = vpop.permute.xlu1 %117  ;;  %v80_v57 = vpop.permute.xlu0 %79  ;;  %1550 = vmatprep.subr.bf16.mxu0 %v1549_v55 }
  0xb2   :  { %v126_v58 = vsel %vm123_vm1, %v1831_v10, %v118_v56  ;;  %v87_v59 = vsel %vm83_vm3, %v78_v49, %v80_v57  ;;  %v388_v0 = vld [vmem:[#allocation3 + $0x60] sm:$0xff] }
  0xb3   :  { %137 = vst [vmem:[#allocation3 + $0x40] sm:$0xf] %v126_v58  ;;  %98 = vst [vmem:[#allocation3 + $0x18] sm:$0xf0] %v87_v59 }
  0xb5   :  { %v157_v60 = vpop.permute.xlu1 %156  ;;  %v120_v61 = vpop.permute.xlu0 %119 }
  0xb6   :  { %v165_v62 = vsel %vm162_vm2, %v1835_v15, %v157_v60  ;;  %v127_v63 = vsel %vm123_vm1, %v118_v56, %v120_v61  ;;  %v394_v1 = vld [vmem:[#allocation3 + $0x90] sm:$0xff] }
  0xb7   :  { %176 = vst [vmem:[#allocation3 + $0x40] sm:$0xf0] %v165_v62  ;;  %138 = vst [vmem:[#allocation3 + $0x48] sm:$0xf] %v127_v63  ;;  %v1551_v2 = vpack.c.bf16 %v394_v1, %v388_v0  ;;  %v378_v20 = vld [vmem:[#allocation3 + $0x10] sm:$0xff] }
  0xb9   :  { %v196_v3 = vpop.permute.xlu1 %195  ;;  %v159_v4 = vpop.permute.xlu0 %158  ;;  %1552 = vmatpush1.bf16.msra.mxu0 %v1551_v2 }
  0xba   :  { %v204_v5 = vsel %vm201_vm4, %v194_v30, %v196_v3  ;;  %v166_v6 = vsel %vm162_vm2, %v157_v60, %v159_v4  ;;  %v379_v17 = vld [vmem:[#allocation3 + $0x18] sm:$0xff] }
  0xbb   :  { %215 = vst [vmem:[#allocation3 + $0x70] sm:$0xf] %v204_v5  ;;  %177 = vst [vmem:[#allocation3 + $0x48] sm:$0xf0] %v166_v6 }
  0xbd   :  { %v235_v7 = vpop.permute.xlu1 %234  ;;  %v198_v8 = vpop.permute.xlu0 %197 }
  0xbe   :  { %v243_v10 = vsel %vm240_vm5, %v233_v33, %v235_v7  ;;  %v205_v11 = vsel %vm201_vm4, %v196_v3, %v198_v8  ;;  %v384_v14 = vld [vmem:[#allocation3 + $0x40] sm:$0xff] }
  0xbf   :  { %254 = vst [vmem:[#allocation3 + $0x70] sm:$0xf0] %v243_v10  ;;  %216 = vst [vmem:[#allocation3 + $0x78] sm:$0xf] %v205_v11  ;;  %v1555_v21 = vpack.c.bf16 %v384_v14, %v378_v20 }
  0xc1   :  { %v274_v12 = vpop.permute.xlu1 %273  ;;  %v1865_v13 = vpop.permute.xlu0 %236 }
  0xc2   :  { %v282_v15 = vsel %vm279_vm6, %v272_v39, %v274_v12  ;;  %v244_v16 = vsel %vm240_vm5, %v235_v7, %v1865_v13  ;;  %v385_v18 = vld [vmem:[#allocation3 + $0x48] sm:$0xff] }
  0xc3   :  { %293 = vst [vmem:[#allocation3 + $0xa0] sm:$0xf] %v282_v15  ;;  %255 = vst [vmem:[#allocation3 + $0x78] sm:$0xf0] %v244_v16  ;;  %v1553_v19 = vpack.c.bf16 %v385_v18, %v379_v17  ;;  %v643_v15 = vlaneseq  ;;  %v42_v18 = vld [vmem:[%s2227_s7] sm:$0x3f] }
  0xc5   :  { %v313_v22 = vpop.permute.xlu1 %312  ;;  %v276_v23 = vpop.permute.xlu0 %275  ;;  %1554 = vmatprep.subr.bf16.mxu1 %v1553_v19  ;;  %v644_v16 = vshrl.u32 %v643_v15, 7  ;;  %v715_v15 = vld [vmem:[%s2223_s3] sm:$0xf]  ;;  %s1682_s3 = smov 19  }
  0xc6   :  { %v321_v24 = vsel %vm2230_vm7, %v1846_v42, %v313_v22  ;;  %v283_v25 = vsel %vm279_vm6, %v274_v12, %v276_v23  ;;  %1556 = vmatpush1.bf16.msra.mxu1 %v1555_v21  ;;  %v390_v41 = vld [vmem:[#allocation3 + $0x70] sm:$0xff] }
  0xc7   :  { %332 = vst [vmem:[#allocation3 + $0xa0] sm:$0xf0] %v321_v24  ;;  %294 = vst [vmem:[#allocation3 + $0xa8] sm:$0xf] %v283_v25  ;;  %v645_v17 = vsub.s32 0, %v644_v16  ;;  %v649_v19 = vsub.s32 1, %v644_v16 }
  0xc9   :  { %v348_v26 = vpop.permute.xlu1 %347  ;;  %v315_v27 = vpop.permute.xlu0 %314  ;;  %v1913_v20 = vrot.slane %v42_v18, %v645_v17  ;;  %v1915_v21 = vrot.slane %v42_v18, %v649_v19 }
  0xca   :  { %v322_v28 = vsel %vm2230_vm7, %v313_v22, %v315_v27  ;;  %v391_v38 = vld [vmem:[#allocation3 + $0x78] sm:$0xff] }
  0xcb   :  { %333 = vst [vmem:[#allocation3 + $0xa8] sm:$0xf0] %v322_v28 }
  0xcd   :  { %v82_v29 = vpop.permute.xlu1 %81  ;;  %v350_v30 = vpop.permute.xlu0 %349 }
  0xce   :  { %v88_v31 = vsel %vm83_vm3, %v80_v57, %v82_v29  ;;  %101 = vst.msk [vmem:[#allocation3 + $0x28] sm:$0xf0] %vm100_vm8, %v82_v29  ;;  %v359_v32 = vsel %vm357_vm9, %v348_v26, %v350_v30  ;;  %v396_v35 = vld [vmem:[#allocation3 + $0xa0] sm:$0xff]  ;;  %v375_v57 = vld [vmem:[%s2221_s1] sm:$0xf] }
  0xcf   :  { %99 = vst [vmem:[#allocation3 + $0x20] sm:$0xf0] %v88_v31  ;;  %370 = vst [vmem:[#allocation3 + $0xc8] sm:$0xf] %v359_v32  ;;  %v1559_v42 = vpack.c.bf16 %v396_v35, %v390_v41  ;;  %v657_v35 = vsub.s32 3, %v644_v16 }
  0xd1   :  { %v161_v33 = vpop.permute.xlu1 %160  ;;  %v122_v34 = vpop.permute.xlu0 %121 }
  0xd2   :  { %v167_v36 = vsel %vm162_vm2, %v159_v4, %v161_v33  ;;  %179 = vst.msk [vmem:[#allocation3 + $0x58] sm:$0xf0] %vm100_vm8, %v161_v33  ;;  %v128_v37 = vsel %vm123_vm1, %v120_v61, %v122_v34  ;;  %v397_v39 = vld [vmem:[#allocation3 + $0xa8] sm:$0xff]  ;;  %v653_v33 = vsub.s32 2, %v644_v16 }
  0xd3   :  { %140 = vst.msk [vmem:[#allocation3 + $0x58] sm:$0xf] %vm60_vm0, %v122_v34  ;;  %178 = vst [vmem:[#allocation3 + $0x50] sm:$0xf0] %v167_v36  ;;  %v1557_v40 = vpack.c.bf16 %v397_v39, %v391_v38  ;;  %v661_v36 = vsub.s32 4, %v644_v16  ;;  %v1933_v39 = vrot.slane %v42_v18, %v657_v35 }
  0xd4   :  { %139 = vst [vmem:[#allocation3 + $0x50] sm:$0xf] %v128_v37  ;;  %v665_v37 = vsub.s32 5, %v644_v16  ;;  %v1931_v38 = vrot.slane %v42_v18, %v653_v33 }
  0xd5   :  { %v200_v43 = vpop.permute.xlu1 %199  ;;  %v346_v44 = vpop.permute.xlu0 %345  ;;  %1558 = vmatprep.subr.bf16.mxu1 %v1557_v40  ;;  %v381_v52 = vld [vmem:[#allocation3 + $0x28] sm:$0xff]  ;;  %v1935_v40 = vrot.slane %v42_v18, %v661_v36 }
  0xd6   :  { %v206_v45 = vsel %vm201_vm4, %v198_v8, %v200_v43  ;;  %218 = vst.msk [vmem:[#allocation3 + $0x88] sm:$0xf] %vm60_vm0, %v200_v43  ;;  %v358_v46 = vsel %vm357_vm9, %v346_v44, %v348_v26  ;;  %1560 = vmatpush1.bf16.msra.mxu1 %v1559_v42  ;;  %v401_v47 = vld [vmem:[#allocation3 + $0xc8] sm:$0xf]  ;;  %v380_v62 = vld [vmem:[#allocation3 + $0x20] sm:$0xff]  ;;  %v1937_v41 = vrot.slane %v42_v18, %v665_v37 }
  0xd7   :  { %217 = vst [vmem:[#allocation3 + $0x80] sm:$0xf] %v206_v45  ;;  %369 = vst [vmem:[#allocation3 + $0xc0] sm:$0xf] %v358_v46  ;;  %1527 = vmatprep.subr.msk.mxu0 %vm410_vm10, %v401_v47  ;;  %v719_v18 = vld [vmem:[%s2224_s4] sm:$0xf] }
  0xd9   :  { %v278_v48 = vpop.permute.xlu1 %277  ;;  %v239_v49 = vpop.permute.xlu0 %238 }
  0xda   :  { %v284_v50 = vsel %vm279_vm6, %v276_v23, %v278_v48  ;;  %296 = vst.msk [vmem:[#allocation3 + $0xb8] sm:$0xf] %vm60_vm0, %v278_v48  ;;  %v245_v51 = vsel %vm240_vm5, %v1865_v13, %v239_v49  ;;  %v387_v53 = vld [vmem:[#allocation3 + $0x58] sm:$0xff] }
  0xdb   :  { %257 = vst.msk [vmem:[#allocation3 + $0x88] sm:$0xf0] %vm100_vm8, %v239_v49  ;;  %295 = vst [vmem:[#allocation3 + $0xb0] sm:$0xf] %v284_v50  ;;  %v386_v54 = vld [vmem:[#allocation3 + $0x50] sm:$0xff]  ;;  %v1561_v61 = vpack.c.bf16 %v387_v53, %v381_v52 }
  0xdc   :  { %256 = vst [vmem:[#allocation3 + $0x80] sm:$0xf0] %v245_v51  ;;  %v1563_v63 = vpack.c.bf16 %v386_v54, %v380_v62 }
  0xdd   :  { %v352_v55 = vpop.permute.xlu1 %351  ;;  %v317_v56 = vpop.permute.xlu0 %316 }
  0xde   :  { %v360_v58 = vsel %vm357_vm9, %v350_v30, %v352_v55  ;;  %v323_v59 = vsel %vm2230_vm7, %v315_v27, %v317_v56  ;;  %335 = vst.msk [vmem:[#allocation3 + $0xb8] sm:$0xf0] %vm100_vm8, %v317_v56  ;;  %v400_v60 = vld [vmem:[#allocation3 + $0xc0] sm:$0xf] }
  0xdf   :  { %371 = vst [vmem:[#allocation3 + $0xd0] sm:$0xf] %v360_v58  ;;  %334 = vst [vmem:[#allocation3 + $0xb0] sm:$0xf0] %v323_v59  ;;  %1528 = vmatpush1.msk.msra.mxu0 %vm410_vm10, %v400_v60 }
  0xe0   :  { %1562 = vmatprep.subr.bf16.mxu0 %v1561_v61  ;;  %1529 = vmatmul.mubr.msk.f32.vlgmr.msra.gmra.mrb[0].mxu0 %vm2229_vm11, %v375_v57 }
  0xe1   :  { %v356_v0 = vpop.permute.xlu1 %355  ;;  %v354_v1 = vpop.permute.xlu0 %353  ;;  %1564 = vmatpush1.bf16.msra.mxu0 %v1563_v63  ;;  %635 = vmatprep.mubr.f32.mxu0 %v1680_v9 }
  0xe2   :  { %374 = vst.msk [vmem:[#allocation3 + $0xe8] sm:$0xf] %vm60_vm0, %v356_v0  ;;  %v361_v2 = vsel %vm357_vm9, %v352_v55, %v354_v1  ;;  %v362_v3 = vsel %vm357_vm9, %v354_v1, %v356_v0  ;;  %v393_v4 = vld [vmem:[#allocation3 + $0x88] sm:$0xff] }
  0xe3   :  { %372 = vst [vmem:[#allocation3 + $0xd8] sm:$0xf] %v361_v2  ;;  %373 = vst [vmem:[#allocation3 + $0xe0] sm:$0xf] %v362_v3  ;;  %v392_v7 = vld [vmem:[#allocation3 + $0x80] sm:$0xff] }
  0xe5   :  { %v399_v5 = vld [vmem:[#allocation3 + $0xb8] sm:$0xff] }
  0xe6   :  { %v1565_v6 = vpack.c.bf16 %v399_v5, %v393_v4  ;;  %v398_v8 = vld [vmem:[#allocation3 + $0xb0] sm:$0xff] }
  0xe7   :  { %v1567_v10 = vpack.c.bf16 %v398_v8, %v392_v7  ;;  %v402_v13 = vld [vmem:[#allocation3 + $0xd0] sm:$0xf] }
  0xe8   :  { %1566 = vmatprep.subr.bf16.mxu0 %v1565_v6  ;;  %v1681_v6 = vmov 0  }
  0xe9   :  { %1568 = vmatpush1.bf16.msra.mxu0 %v1567_v10  ;;  %v405_v11 = vld [vmem:[#allocation3 + $0xe8] sm:$0xf]  ;;  %1606 = vset.pattern.permute.xlu0 %v1681_v6 }
  0xea   :  { %v403_v12 = vld [vmem:[#allocation3 + $0xd8] sm:$0xf]  ;;  %1533 = vmatprep.subr.msk.mxu0 %vm410_vm10, %v405_v11  ;;  %v404_v14 = vld [vmem:[#allocation3 + $0xe0] sm:$0xf]  ;;  %1607 = vset.pattern.permute.xlu1 %v1681_v6 }
  0xeb   :  { %1530 = vmatprep.subr.msk.mxu1 %vm410_vm10, %v403_v12 }
  0xec   :  { %1531 = vmatpush1.msk.msra.mxu1 %vm410_vm10, %v402_v13 }
  0xed   :  { %1532 = vmatmul.mubr.msk.f32.vlgmr.msra.gmra.mrb[0].mxu1 %vm2229_vm11, %v375_v57  ;;  %1534 = vmatpush1.msk.msra.mxu0 %vm410_vm10, %v404_v14 }
  0xee   :  { %1535 = vmatmul.mubr.msk.f32.vlgmr.msra.gmra.mrb[2].mxu0 %vm2229_vm11, %v375_v57  ;;  %1232 = vmatprep.mubr.f32.mxu1 %v1680_v9  ;;  %vm791_vm11 = vcmask 220164  }
  0xef   :  { %1303 = vmatprep.mubr.f32.mxu0 %v1680_v9  ;;  %vm792_vm7 = vmor %vm791_vm11, %vm410_vm10 }
 0x1b3   :  { %v1917_v22 = vpop.f32.mrb[0].mxu0 }
 0x1b4   :  { %v673_v23 = vmul.f32 %v1913_v20, %v1917_v22  ;;  %v1921_v24 = vpop.f32.mrb[1].mxu0 }
 0x1b5   :  { %v674_v25 = vmul.f32 %v1915_v21, %v1921_v24 }
 0x1b6   :  { %v679_v26 = vsel %vm410_vm10, %v673_v23, 0.0  ;;  %v692_v27 = vmul.f32 %v673_v23, %v1917_v22 }
 0x1b7   :  { %v680_v28 = vsel %vm410_vm10, %v674_v25, 0.0  ;;  %v693_v29 = vmul.f32 %v674_v25, %v1921_v24 }
 0x1b8   :  { %v698_v30 = vsel %vm410_vm10, %v692_v27, 0.0  ;;  %v681_v31 = vadd.f32 %v680_v28, %v679_v26 }
 0x1b9   :  { %v699_v32 = vsel %vm410_vm10, %v693_v29, 0.0 }
 0x1ba   :  { %v700_v34 = vadd.f32 %v699_v32, %v698_v30 }
 0x1c0   :  { %v566_v42 = vpop.f32.mrb[0].mxu1 }
 0x1c1   :  { %v675_v43 = vmul.f32 %v1931_v38, %v566_v42  ;;  %v568_v44 = vpop.f32.mrb[1].mxu1  ;;  %v637_v45 = vpop.f32.mrb[2].mxu0 }
 0x1c2   :  { %v676_v46 = vmul.f32 %v1933_v39, %v568_v44  ;;  %v677_v47 = vmul.f32 %v1935_v40, %v637_v45  ;;  %v639_v48 = vpop.f32.mrb[3].mxu0 }
 0x1c3   :  { %v682_v49 = vsel %vm410_vm10, %v675_v43, 0.0  ;;  %v694_v50 = vmul.f32 %v675_v43, %v566_v42  ;;  %v678_v51 = vmul.f32 %v1937_v41, %v639_v48 }
 0x1c4   :  { %v683_v52 = vadd.f32 %v682_v49, %v681_v31  ;;  %v684_v53 = vsel %vm410_vm10, %v676_v46, 0.0  ;;  %v695_v54 = vmul.f32 %v676_v46, %v568_v44  ;;  %v696_v56 = vmul.f32 %v677_v47, %v637_v45 }
 0x1c5   :  { %v701_v55 = vsel %vm410_vm10, %v694_v50, 0.0  ;;  %v686_v57 = vsel %vm410_vm10, %v677_v47, 0.0  ;;  %v697_v61 = vmul.f32 %v678_v51, %v639_v48  ;;  %v688_v0 = vsel %vm60_vm0, %v678_v51, 0.0 }
 0x1c6   :  { %v702_v58 = vadd.f32 %v701_v55, %v700_v34  ;;  %v703_v59 = vsel %vm410_vm10, %v695_v54, 0.0  ;;  %v685_v60 = vadd.f32 %v684_v53, %v683_v52  ;;  %v705_v1 = vsel %vm410_vm10, %v696_v56, 0.0 }
 0x1c7   :  { %v707_v4 = vsel %vm60_vm0, %v697_v61, 0.0 }
 0x1c8   :  { %v687_v62 = vadd.f32 %v686_v57, %v685_v60  ;;  %v704_v63 = vadd.f32 %v703_v59, %v702_v58 }
 0x1ca   :  { %v689_v2 = vadd.f32 %v688_v0, %v687_v62  ;;  %v706_v3 = vadd.f32 %v705_v1, %v704_v63 }
 0x1cc   :  { %690 = vadd.xlane.f32.xlu0 %v689_v2  ;;  %v708_v5 = vadd.f32 %v707_v4, %v706_v3 }
 0x1ce   :  { %709 = vadd.xlane.f32.xlu1 %v708_v5 }
 0x259   :  { %v691_v7 = vpop.xlane.xlu0 %690 }
 0x25a   :  { %v711_v8 = vmul.f32 0.001953125, %v691_v7 }
 0x25b   :  { %v710_v10 = vpop.xlane.xlu1 %709 }
 0x25c   :  { %v713_v11 = vmul.f32 %v711_v8, %v711_v8  ;;  %v712_v12 = vmul.f32 0.001953125, %v710_v10 }
 0x25e   :  { %v714_v13 = vsub.f32 %v712_v12, %v713_v11 }
 0x260   :  { %v716_v14 = vadd.f32 1e-05, %v714_v13 }
 0x262   :  { %1619 = vrsqrt.f32 %v716_v14 }
 0x26c   :  { %v1620_v16 = vpop.eup %1619 }
 0x26d   :  { %v718_v17 = vmul.f32 %v1620_v16, %v715_v15 }
 0x26f   :  { %724 = vperm.xlu0 %1606, %v718_v17   ;;  %v720_v19 = vmul.f32 %v718_v17, %v711_v8 }
 0x271   :  { %v721_v23 = vsub.f32 %v719_v18, %v720_v19 }
 0x273   :  { %735 = vperm.xlu1 %1607, %v721_v23  }
 0x2ee   :  { %v725_v25 = vpop.permute.xlu0 %724 }
 0x2ef   :  { %v727_v26 = vmul.f32 %v725_v25, %v1917_v22  ;;  %v728_v27 = vmul.f32 %v725_v25, %v1921_v24  ;;  %v729_v28 = vmul.f32 %v725_v25, %v566_v42  ;;  %v730_v29 = vmul.f32 %v725_v25, %v568_v44 }
 0x2f0   :  { %v731_v31 = vmul.f32 %v725_v25, %v637_v45  ;;  %v732_v32 = vmul.f32 %v725_v25, %v639_v48 }
 0x2f2   :  { %v736_v30 = vpop.permute.xlu1 %735 }
 0x2f3   :  { %v738_v33 = vadd.f32 %v736_v30, %v727_v26  ;;  %v739_v34 = vadd.f32 %v736_v30, %v728_v27  ;;  %v740_v35 = vadd.f32 %v736_v30, %v729_v28  ;;  %v741_v36 = vadd.f32 %v736_v30, %v730_v29 }
 0x2f4   :  { %v742_v37 = vadd.f32 %v736_v30, %v731_v31  ;;  %v743_v43 = vadd.f32 %v736_v30, %v732_v32 }
 0x2f5   :  { %v744_v46 = vmax.f32 %v738_v33, 0.0  ;;  %v745_v47 = vmax.f32 %v739_v34, 0.0  ;;  %v746_v49 = vmax.f32 %v740_v35, 0.0  ;;  %v747_v50 = vmax.f32 %v741_v36, 0.0 }
 0x2f6   :  { %v748_v51 = vmax.f32 %v742_v37, 0.0  ;;  %v749_v52 = vmax.f32 %v743_v43, 0.0 }
 0x2f7   :  { %v750_v22 = vmul.f32 %v744_v46, %v1913_v20  ;;  %v751_v24 = vmul.f32 %v745_v47, %v1915_v21  ;;  %v752_v42 = vmul.f32 %v746_v49, %v1931_v38  ;;  %v753_v44 = vmul.f32 %v747_v50, %v1933_v39 }
 0x2f8   :  { %v754_v45 = vmul.f32 %v748_v51, %v1935_v40  ;;  %v755_v48 = vmul.f32 %v749_v52, %v1937_v41 }
 0x2f9   :  { %v765_v53 = vcombine.low %v750_v22, %v751_v24  ;;  %v766_v54 = vcombine.low %v752_v42, %v753_v44 }
 0x2fa   :  { %v767_v55 = vcombine.low %v754_v45, %v755_v48 }
 0x2fb   :  { %768 = vrot.lane.b32.xlu1 %v765_v53, %s1682_s3 }
 0x2ff   :  { %770 = vrot.lane.b32.xlu1 %v766_v54, %s1682_s3 }
 0x303   :  { %772 = vrot.lane.b32.xlu1 %v767_v55, %s1682_s3 }
 0x36d   :  { %v769_v56 = vpop.permute.xlu1 %768 }
 0x36e   :  { %v774_v57 = vrot.slane %v769_v56, 4 }
 0x370   :  { %v778_v58 = vsel %vm777_vm14, %v774_v57, %v769_v56 }
 0x371   :  { %789 = vst.msk [vmem:[#allocation2] sm:$0xff] %vm788_vm15, %v778_v58  ;;  %v771_v59 = vpop.permute.xlu1 %770 }
 0x372   :  { %v775_v60 = vrot.slane %v771_v59, 4 }
 0x374   :  { %v779_v61 = vsel %vm410_vm10, %v774_v57, %v775_v60 }
 0x375   :  { %v780_v62 = vsel %vm777_vm14, %v779_v61, %v771_v59  ;;  %v773_v63 = vpop.permute.xlu1 %772 }
 0x376   :  { %v801_v0 = vcombine.high %v780_v62, %v780_v62  ;;  %808 = vst [vmem:[#allocation3 + $0x10] sm:$0xf] %v780_v62  ;;  %v776_v1 = vrot.slane %v773_v63, 4  ;;  %v819_v10 = vcombine.low %v780_v62, %v780_v62 }
 0x378   :  { %v794_v2 = vld [vmem:[#allocation2] sm:$0xff]  ;;  %809 = vst [vmem:[#allocation3 + $0x18] sm:$0xf] %v801_v0  ;;  %v781_v3 = vsel %vm410_vm10, %v775_v60, %v776_v1 }
 0x379   :  { %v800_v4 = vcombine.high %v794_v2, %v794_v2  ;;  %806 = vst [vmem:[#allocation3] sm:$0xf] %v794_v2  ;;  %v782_v5 = vsel %vm777_vm14, %v781_v3, %v773_v63  ;;  %859 = vrot.lane.b32.xlu0 %v794_v2, %s1672_s17  ;;  %823 = vrot.lane.b32.xlu1 %v794_v2, %s1673_s18 }
 0x37a   :  { %793 = vst.msk [vmem:[#allocation2 + $0x10] sm:$0xff] %vm792_vm7, %v782_v5  ;;  %v818_v8 = vcombine.low %v794_v2, %v794_v2  ;;  %vm2231_vm7 = vcmask 744448  }
 0x37b   :  { %807 = vst [vmem:[#allocation3 + $0x8] sm:$0xf] %v800_v4  ;;  %vm2232_vm11 = vmmov %vm2231_vm7 }
 0x37c   :  { %vm2233_vm12 = vmmov %vm2231_vm7 }
 0x37d   :  { %975 = vrot.lane.b32.xlu0 %v794_v2, %s1676_s20  ;;  %899 = vrot.lane.b32.xlu1 %v794_v2, %s1674_s0 }
 0x381   :  { %v796_v6 = vld [vmem:[#allocation2 + $0x10] sm:$0xff]  ;;  %1051 = vrot.lane.b32.xlu0 %v794_v2, %s1678_s22  ;;  %1087 = vrot.lane.b32.xlu1 %v794_v2, %s1679_s23 }
 0x382   :  { %v802_v7 = vcombine.high %v796_v6, %v796_v6  ;;  %810 = vst [vmem:[#allocation3 + $0x20] sm:$0xf] %v796_v6  ;;  %v972_v11 = vcombine.low %v796_v6, %v796_v6 }
 0x384   :  { %811 = vst.msk [vmem:[#allocation3 + $0x28] sm:$0xf] %vm60_vm0, %v802_v7 }
 0x385   :  { %935 = vrot.lane.b32.xlu0 %v794_v2, %s1675_s19  ;;  %939 = vrot.lane.b32.xlu1 %v780_v62, %s1675_s19 }
 0x389   :  { %1011 = vrot.lane.b32.xlu0 %v794_v2, %s1677_s21  ;;  %1015 = vrot.lane.b32.xlu1 %v780_v62, %s1677_s21 }
 0x38d   :  { %863 = vrot.lane.b32.xlu0 %v780_v62, %s1672_s17  ;;  %867 = vrot.lane.b32.xlu1 %v796_v6, %s1672_s17 }
 0x391   :  { %827 = vrot.lane.b32.xlu0 %v780_v62, %s1673_s18  ;;  %943 = vrot.lane.b32.xlu1 %v796_v6, %s1675_s19 }
 0x395   :  { %903 = vrot.lane.b32.xlu0 %v780_v62, %s1674_s0  ;;  %1019 = vrot.lane.b32.xlu1 %v796_v6, %s1677_s21 }
 0x399   :  { %979 = vrot.lane.b32.xlu0 %v780_v62, %s1676_s20  ;;  %1091 = vrot.lane.b32.xlu1 %v780_v62, %s1679_s23 }
 0x39d   :  { %1055 = vrot.lane.b32.xlu0 %v780_v62, %s1678_s22  ;;  %983 = vrot.lane.b32.xlu1 %v796_v6, %s1676_s20 }
 0x3a1   :  { %861 = vrot.lane.b32.xlu1 %v800_v4, %s1672_s17  ;;  %831 = vrot.lane.b32.xlu0 %v796_v6, %s1673_s18 }
 0x3a5   :  { %821 = vrot.lane.b32.xlu1 %v818_v8, %s1673_s18  ;;  %907 = vrot.lane.b32.xlu0 %v796_v6, %s1674_s0 }
 0x3a9   :  { %897 = vrot.lane.b32.xlu1 %v818_v8, %s1674_s0  ;;  %937 = vrot.lane.b32.xlu0 %v800_v4, %s1675_s19 }
 0x3ad   :  { %973 = vrot.lane.b32.xlu1 %v818_v8, %s1676_s20  ;;  %1013 = vrot.lane.b32.xlu0 %v800_v4, %s1677_s21 }
 0x3b1   :  { %1049 = vrot.lane.b32.xlu1 %v818_v8, %s1678_s22  ;;  %1089 = vrot.lane.b32.xlu0 %v800_v4, %s1679_s23 }
 0x3b5   :  { %825 = vrot.lane.b32.xlu1 %v819_v10, %s1673_s18  ;;  %901 = vrot.lane.b32.xlu0 %v819_v10, %s1674_s0 }
 0x3b9   :  { %977 = vrot.lane.b32.xlu1 %v819_v10, %s1676_s20  ;;  %865 = vrot.lane.b32.xlu0 %v801_v0, %s1672_s17 }
 0x3bd   :  { %1053 = vrot.lane.b32.xlu1 %v819_v10, %s1678_s22  ;;  %941 = vrot.lane.b32.xlu0 %v801_v0, %s1675_s19 }
 0x3c1   :  { %1017 = vrot.lane.b32.xlu0 %v801_v0, %s1677_s21  ;;  %829 = vrot.lane.b32.xlu1 %v972_v11, %s1673_s18 }
 0x3c5   :  { %945 = vrot.lane.b32.xlu0 %v802_v7, %s1675_s19  ;;  %905 = vrot.lane.b32.xlu1 %v972_v11, %s1674_s0 }
 0x3c9   :  { %1021 = vrot.lane.b32.xlu0 %v802_v7, %s1677_s21  ;;  %981 = vrot.lane.b32.xlu1 %v972_v11, %s1676_s20 }
 0x3cd   :  { %1093 = vrot.lane.b32.xlu0 %v801_v0, %s1679_s23  ;;  %1057 = vrot.lane.b32.xlu1 %v972_v11, %s1678_s22 }
 0x3d1   :  { %1097 = vrot.lane.b32.xlu0 %v802_v7, %s1679_s23  ;;  %869 = vrot.lane.b32.xlu1 %v802_v7, %s1672_s17 }
 0x3d5   :  { %1059 = vrot.lane.b32.xlu1 %v796_v6, %s1678_s22 }
 0x3d9   :  { %1095 = vrot.lane.b32.xlu1 %v796_v6, %s1679_s23 }
 0x3eb   :  { %v860_v12 = vpop.permute.xlu0 %859  ;;  %v824_v13 = vpop.permute.xlu1 %823 }
 0x3ef   :  { %v2020_v14 = vpop.permute.xlu0 %975  ;;  %v900_v15 = vpop.permute.xlu1 %899 }
 0x3f3   :  { %v2022_v16 = vpop.permute.xlu0 %1051  ;;  %v1088_v17 = vpop.permute.xlu1 %1087 }
 0x3f7   :  { %v936_v18 = vpop.permute.xlu0 %935  ;;  %v2024_v19 = vpop.permute.xlu1 %939 }
 0x3fb   :  { %v1012_v23 = vpop.permute.xlu0 %1011  ;;  %v2026_v25 = vpop.permute.xlu1 %1015 }
 0x3ff   :  { %v864_v26 = vpop.permute.xlu0 %863  ;;  %v2028_v27 = vpop.permute.xlu1 %867 }
 0x403   :  { %v2030_v28 = vpop.permute.xlu0 %827  ;;  %v2032_v29 = vpop.permute.xlu1 %943 }
 0x407   :  { %v2034_v30 = vpop.permute.xlu0 %903  ;;  %v2036_v31 = vpop.permute.xlu1 %1019 }
 0x40b   :  { %v2038_v32 = vpop.permute.xlu0 %979  ;;  %v2040_v33 = vpop.permute.xlu1 %1091 }
 0x40f   :  { %v2042_v34 = vpop.permute.xlu0 %1055  ;;  %v2044_v35 = vpop.permute.xlu1 %983 }
 0x410   :  { %1001 = vst.msk [vmem:[#allocation3 + $0x88] sm:$0xf0] %vm100_vm8, %v2044_v35 }
 0x413   :  { %v2048_v36 = vpop.permute.xlu0 %831  ;;  %v862_v37 = vpop.permute.xlu1 %861 }
 0x414   :  { %849 = vst.msk [vmem:[#allocation3 + $0x28] sm:$0xf0] %vm100_vm8, %v2048_v36  ;;  %v871_v43 = vsel %vm123_vm1, %v860_v12, %v862_v37  ;;  %v872_v46 = vsel %vm123_vm1, %v862_v37, %v864_v26 }
 0x415   :  { %882 = vst [vmem:[#allocation3 + $0x30] sm:$0xf] %v871_v43  ;;  %883 = vst [vmem:[#allocation3 + $0x38] sm:$0xf] %v872_v46 }
 0x417   :  { %v2054_v47 = vpop.permute.xlu0 %907  ;;  %v822_v49 = vpop.permute.xlu1 %821 }
 0x418   :  { %925 = vst.msk [vmem:[#allocation3 + $0x58] sm:$0xf0] %vm100_vm8, %v2054_v47  ;;  %v833_v50 = vsel %vm83_vm3, %v822_v49, %v824_v13 }
 0x419   :  { %844 = vst [vmem:[#allocation3] sm:$0xf0] %v833_v50 }
 0x41b   :  { %v938_v51 = vpop.permute.xlu0 %937  ;;  %v898_v52 = vpop.permute.xlu1 %897 }
 0x41c   :  { %v947_v22 = vsel %vm201_vm4, %v936_v18, %v938_v51  ;;  %v948_v24 = vsel %vm201_vm4, %v938_v51, %v2024_v19  ;;  %v909_v42 = vsel %vm162_vm2, %v898_v52, %v900_v15 }
 0x41d   :  { %958 = vst [vmem:[#allocation3 + $0x60] sm:$0xf] %v947_v22  ;;  %959 = vst [vmem:[#allocation3 + $0x68] sm:$0xf] %v948_v24 }
 0x41e   :  { %920 = vst [vmem:[#allocation3 + $0x30] sm:$0xf0] %v909_v42 }
 0x41f   :  { %v1014_v44 = vpop.permute.xlu0 %1013  ;;  %v974_v45 = vpop.permute.xlu1 %973 }
 0x420   :  { %v1023_v48 = vsel %vm279_vm6, %v1012_v23, %v1014_v44  ;;  %v1024_v53 = vsel %vm279_vm6, %v1014_v44, %v2026_v25  ;;  %v985_v54 = vsel %vm240_vm5, %v974_v45, %v2020_v14 }
 0x421   :  { %1034 = vst [vmem:[#allocation3 + $0x90] sm:$0xf] %v1023_v48  ;;  %1035 = vst [vmem:[#allocation3 + $0x98] sm:$0xf] %v1024_v53 }
 0x422   :  { %996 = vst [vmem:[#allocation3 + $0x60] sm:$0xf0] %v985_v54 }
 0x423   :  { %v1090_v55 = vpop.permute.xlu0 %1089  ;;  %v1050_v56 = vpop.permute.xlu1 %1049 }
 0x424   :  { %v1099_v57 = vsel %vm357_vm9, %v1088_v17, %v1090_v55  ;;  %v1100_v58 = vsel %vm357_vm9, %v1090_v55, %v2040_v33  ;;  %v1061_v59 = vsel %vm2231_vm7, %v1050_v56, %v2022_v16  ;;  %v2120_v56 = vld [vmem:[%s2222_s2] sm:$0xf] }
 0x425   :  { %1110 = vst [vmem:[#allocation3 + $0xc0] sm:$0xf] %v1099_v57  ;;  %1111 = vst [vmem:[#allocation3 + $0xc8] sm:$0xf] %v1100_v58  ;;  %v1123_v11 = vld [vmem:[#allocation3 + $0x30] sm:$0xff] }
 0x426   :  { %1072 = vst [vmem:[#allocation3 + $0x90] sm:$0xf0] %v1061_v59 }
 0x427   :  { %v902_v60 = vpop.permute.xlu0 %901  ;;  %v826_v61 = vpop.permute.xlu1 %825 }
 0x428   :  { %v910_v62 = vsel %vm162_vm2, %v900_v15, %v902_v60  ;;  %v911_v63 = vsel %vm162_vm2, %v902_v60, %v2034_v30  ;;  %v834_v0 = vsel %vm83_vm3, %v824_v13, %v826_v61  ;;  %v835_v1 = vsel %vm83_vm3, %v826_v61, %v2030_v28 }
 0x429   :  { %921 = vst [vmem:[#allocation3 + $0x38] sm:$0xf0] %v910_v62  ;;  %922 = vst [vmem:[#allocation3 + $0x40] sm:$0xf0] %v911_v63  ;;  %v1129_v45 = vld [vmem:[#allocation3 + $0x60] sm:$0xff] }
 0x42a   :  { %845 = vst [vmem:[#allocation3 + $0x8] sm:$0xf0] %v834_v0  ;;  %846 = vst [vmem:[#allocation3 + $0x10] sm:$0xf0] %v835_v1 }
 0x42b   :  { %v866_v2 = vpop.permute.xlu0 %865  ;;  %v978_v3 = vpop.permute.xlu1 %977 }
 0x42c   :  { %v873_v4 = vsel %vm123_vm1, %v864_v26, %v866_v2  ;;  %v874_v5 = vsel %vm123_vm1, %v866_v2, %v2028_v27  ;;  %v986_v6 = vsel %vm240_vm5, %v2020_v14, %v978_v3  ;;  %v987_v7 = vsel %vm240_vm5, %v978_v3, %v2038_v32  ;;  %v1117_v26 = vld [vmem:[#allocation3] sm:$0xff]  ;;  %v1142_v55 = vld [vmem:[#allocation3 + $0xc8] sm:$0xf] }
 0x42d   :  { %884 = vst [vmem:[#allocation3 + $0x40] sm:$0xf] %v873_v4  ;;  %885 = vst [vmem:[#allocation3 + $0x48] sm:$0xf] %v874_v5  ;;  %v1571_v37 = vpack.c.bf16 %v1123_v11, %v1117_v26  ;;  %v1135_v22 = vld [vmem:[#allocation3 + $0x90] sm:$0xff]  ;;  %v1122_v11 = vld [vmem:[#allocation3 + $0x28] sm:$0xff] }
 0x42e   :  { %997 = vst [vmem:[#allocation3 + $0x68] sm:$0xf0] %v986_v6  ;;  %998 = vst [vmem:[#allocation3 + $0x70] sm:$0xf0] %v987_v7  ;;  %v1575_v48 = vpack.c.bf16 %v1135_v22, %v1129_v45  ;;  %v1141_v58 = vld [vmem:[#allocation3 + $0xc0] sm:$0xf] }
 0x42f   :  { %v942_v8 = vpop.permute.xlu0 %941  ;;  %v1054_v10 = vpop.permute.xlu1 %1053 }
 0x430   :  { %v949_v12 = vsel %vm201_vm4, %v2024_v19, %v942_v8  ;;  %v950_v13 = vsel %vm201_vm4, %v942_v8, %v2032_v29  ;;  %v1062_v15 = vsel %vm2232_vm11, %v2022_v16, %v1054_v10  ;;  %v1063_v14 = vsel %vm2233_vm12, %v1054_v10, %v2042_v34  ;;  %v1124_v18 = vld [vmem:[#allocation3 + $0x38] sm:$0xff] }
 0x431   :  { %v1118_v17 = vld [vmem:[#allocation3 + $0x8] sm:$0xff]  ;;  %960 = vst [vmem:[#allocation3 + $0x70] sm:$0xf] %v949_v12  ;;  %961 = vst [vmem:[#allocation3 + $0x78] sm:$0xf] %v950_v13  ;;  %v1119_v63 = vld [vmem:[#allocation3 + $0x10] sm:$0xff] }
 0x432   :  { %1073 = vst [vmem:[#allocation3 + $0x98] sm:$0xf0] %v1062_v15  ;;  %1074 = vst [vmem:[#allocation3 + $0xa0] sm:$0xf0] %v1063_v14  ;;  %v1569_v23 = vpack.c.bf16 %v1124_v18, %v1118_v17 }
 0x433   :  { %v1018_v43 = vpop.permute.xlu0 %1017  ;;  %v830_v19 = vpop.permute.xlu1 %829 }
 0x434   :  { %1570 = vmatprep.subr.bf16.mxu1 %v1569_v23  ;;  %v1025_v46 = vsel %vm279_vm6, %v2026_v25, %v1018_v43  ;;  %v1026_v16 = vsel %vm279_vm6, %v1018_v43, %v2036_v31  ;;  %v836_v49 = vsel %vm83_vm3, %v2030_v28, %v830_v19  ;;  %v837_v50 = vsel %vm83_vm3, %v830_v19, %v2048_v36  ;;  %v1125_v59 = vld [vmem:[#allocation3 + $0x40] sm:$0xff] }
 0x435   :  { %1572 = vmatpush1.bf16.msra.mxu1 %v1571_v37  ;;  %1036 = vst [vmem:[#allocation3 + $0xa0] sm:$0xf] %v1025_v46  ;;  %1037 = vst [vmem:[#allocation3 + $0xa8] sm:$0xf] %v1026_v16  ;;  %v1130_v36 = vld [vmem:[#allocation3 + $0x68] sm:$0xff]  ;;  %vm2235_vm3 = vcmask 293888   ;;  %v1579_v0 = vpack.c.bf16 %v1125_v59, %v1119_v63 }
 0x436   :  { %847 = vst [vmem:[#allocation3 + $0x18] sm:$0xf0] %v836_v49  ;;  %848 = vst [vmem:[#allocation3 + $0x20] sm:$0xf0] %v837_v50 }
 0x437   :  { %v946_v51 = vpop.permute.xlu0 %945  ;;  %v906_v52 = vpop.permute.xlu1 %905 }
 0x438   :  { %v951_v25 = vsel %vm201_vm4, %v2032_v29, %v946_v51  ;;  %963 = vst.msk [vmem:[#allocation3 + $0x88] sm:$0xf] %vm60_vm0, %v946_v51  ;;  %v912_v24 = vsel %vm162_vm2, %v2034_v30, %v906_v52  ;;  %v913_v28 = vsel %vm162_vm2, %v906_v52, %v2054_v47  ;;  %vm2234_vm2 = vmmov %vm2231_vm7  ;;  %v1131_v7 = vld [vmem:[#allocation3 + $0x70] sm:$0xff] }
 0x439   :  { %v1136_v42 = vld [vmem:[#allocation3 + $0x98] sm:$0xff]  ;;  %962 = vst [vmem:[#allocation3 + $0x80] sm:$0xf] %v951_v25  ;;  %923 = vst [vmem:[#allocation3 + $0x48] sm:$0xf0] %v912_v24 }
 0x43a   :  { %924 = vst [vmem:[#allocation3 + $0x50] sm:$0xf0] %v913_v28  ;;  %v1573_v44 = vpack.c.bf16 %v1136_v42, %v1130_v36 }
 0x43b   :  { %v1022_v53 = vpop.permute.xlu0 %1021  ;;  %v982_v54 = vpop.permute.xlu1 %981 }
 0x43c   :  { %1574 = vmatprep.subr.bf16.mxu1 %v1573_v44  ;;  %v1027_v29 = vsel %vm279_vm6, %v2036_v31, %v1022_v53  ;;  %1039 = vst.msk [vmem:[#allocation3 + $0xb8] sm:$0xf] %vm60_vm0, %v1022_v53  ;;  %v988_v30 = vsel %vm240_vm5, %v2038_v32, %v982_v54  ;;  %v989_v47 = vsel %vm240_vm5, %v982_v54, %v2044_v35  ;;  %v1137_v3 = vld [vmem:[#allocation3 + $0xa0] sm:$0xff]  ;;  %vm2236_vm5 = vmmov %vm2234_vm2 }
 0x43d   :  { %1576 = vmatpush1.bf16.msra.mxu1 %v1575_v48  ;;  %1038 = vst [vmem:[#allocation3 + $0xb0] sm:$0xf] %v1027_v29  ;;  %999 = vst [vmem:[#allocation3 + $0x78] sm:$0xf0] %v988_v30  ;;  %v1120_v60 = vld [vmem:[#allocation3 + $0x18] sm:$0xff]  ;;  %v1583_v8 = vpack.c.bf16 %v1137_v3, %v1131_v7  ;;  %v1121_v14 = vld [vmem:[#allocation3 + $0x20] sm:$0xff] }
 0x43e   :  { %1000 = vst [vmem:[#allocation3 + $0x80] sm:$0xf0] %v989_v47  ;;  %1536 = vmatprep.subr.msk.mxu1 %vm410_vm10, %v1142_v55 }
 0x43f   :  { %v1094_v31 = vpop.permute.xlu0 %1093  ;;  %v1058_v57 = vpop.permute.xlu1 %1057  ;;  %v1134_v23 = vld [vmem:[#allocation3 + $0x88] sm:$0xff] }
 0x440   :  { %v1101_v32 = vsel %vm357_vm9, %v2040_v33, %v1094_v31  ;;  %v1064_v35 = vsel %vm2234_vm2, %v2042_v34, %v1058_v57  ;;  %v1126_v61 = vld [vmem:[#allocation3 + $0x48] sm:$0xff] }
 0x441   :  { %1537 = vmatpush1.msk.msra.mxu1 %vm410_vm10, %v1141_v58  ;;  %1112 = vst [vmem:[#allocation3 + $0xd0] sm:$0xf] %v1101_v32  ;;  %1075 = vst [vmem:[#allocation3 + $0xa8] sm:$0xf0] %v1064_v35  ;;  %v1577_v62 = vpack.c.bf16 %v1126_v61, %v1120_v60 }
 0x442   :  { %1538 = vmatmul.mubr.msk.f32.vlgmr.msra.gmra.mrb[2].mxu1 %vm2235_vm3, %v2120_v56 }
 0x443   :  { %1374 = vmatprep.mubr.f32.mxu1 %v1680_v9  ;;  %v1098_v1 = vpop.permute.xlu0 %1097  ;;  %1578 = vmatprep.subr.bf16.mxu0 %v1577_v62  ;;  %v870_v33 = vpop.permute.xlu1 %869 }
 0x444   :  { %1115 = vst.msk [vmem:[#allocation3 + $0xe8] sm:$0xf] %vm60_vm0, %v1098_v1  ;;  %v875_v34 = vsel %vm123_vm1, %v2028_v27, %v870_v33  ;;  %887 = vst.msk [vmem:[#allocation3 + $0x58] sm:$0xf] %vm60_vm0, %v870_v33  ;;  %1580 = vmatpush1.bf16.msra.mxu0 %v1579_v0  ;;  %v1132_v5 = vld [vmem:[#allocation3 + $0x78] sm:$0xff] }
 0x445   :  { %886 = vst [vmem:[#allocation3 + $0x50] sm:$0xf] %v875_v34  ;;  %v1133_v43 = vld [vmem:[#allocation3 + $0x80] sm:$0xff]  ;;  %vm2237_vm1 = vmmov %vm2235_vm3 }
 0x446   :  { %vm2238_vm6 = vmmov %vm2237_vm1 }
 0x447   :  { %v1060_v2 = vpop.permute.xlu1 %1059 }
 0x448   :  { %v1065_v4 = vsel %vm2236_vm5, %v1058_v57, %v1060_v2  ;;  %1077 = vst.msk [vmem:[#allocation3 + $0xb8] sm:$0xf0] %vm100_vm8, %v1060_v2  ;;  %v1138_v9 = vld [vmem:[#allocation3 + $0xa8] sm:$0xff]  ;;  %v1143_v50 = vld [vmem:[#allocation3 + $0xd0] sm:$0xf] }
 0x449   :  { %1076 = vst [vmem:[#allocation3 + $0xb0] sm:$0xf0] %v1065_v4  ;;  %v1581_v6 = vpack.c.bf16 %v1138_v9, %v1132_v5  ;;  %v1452_v5 = vld [vmem:[#allocation4] sm:$0xff] }
 0x44a   :  { %v1458_v9 = vcombine.high %v1452_v5, %v1452_v5 }
 0x44b   :  { %1582 = vmatprep.subr.bf16.mxu0 %v1581_v6  ;;  %v1096_v10 = vpop.permute.xlu1 %1095  ;;  %v1128_v27 = vld [vmem:[#allocation3 + $0x58] sm:$0xff]  ;;  %v1146_v16 = vld [vmem:[#allocation3 + $0xe8] sm:$0xf] }
 0x44c   :  { %v1102_v12 = vsel %vm357_vm9, %v1094_v31, %v1096_v10  ;;  %v1103_v13 = vsel %vm357_vm9, %v1096_v10, %v1098_v1  ;;  %1584 = vmatpush1.bf16.msra.mxu0 %v1583_v8  ;;  %v1585_v15 = vpack.c.bf16 %v1128_v27, %v1122_v11  ;;  %v1127_v17 = vld [vmem:[#allocation3 + $0x50] sm:$0xff] }
 0x44d   :  { %1113 = vst [vmem:[#allocation3 + $0xd8] sm:$0xf] %v1102_v12  ;;  %1114 = vst [vmem:[#allocation3 + $0xe0] sm:$0xf] %v1103_v13  ;;  %v1587_v18 = vpack.c.bf16 %v1127_v17, %v1121_v14  ;;  %v1423_v13 = vld [vmem:[%s2225_s5] sm:$0xf] }
 0x44e   :  { %1586 = vmatprep.subr.bf16.mxu1 %v1585_v15  ;;  %v1453_v14 = vld [vmem:[#allocation4 + $0x8] sm:$0xff]  ;;  %s1683_s5 = smov [#allocation7]  }
 0x44f   :  { %1588 = vmatpush1.bf16.msra.mxu1 %v1587_v18  ;;  %v1140_v26 = vld [vmem:[#allocation3 + $0xb8] sm:$0xff]  ;;  %v1427_v18 = vld [vmem:[%s2226_s6] sm:$0xf]  ;;  %s1518_s6 = sshll.u32 %s1683_s5, 4  ;;  %s1519_s6 = int_to_ptr.vmem [resolvable:$true] %s1518_s6 }
 0x450   :  { %v1589_v37 = vpack.c.bf16 %v1140_v26, %v1134_v23  ;;  %v1139_v19 = vld [vmem:[#allocation3 + $0xb0] sm:$0xff]  ;;  %v1459_v26 = vcombine.high %v1453_v14, %v1453_v14  ;;  %s1645_s12 = scalar_lea.vmem %s1519_s6, 384  ;;  %p1650_p9 = scmp.lt.s32.totalorder %s1519_s6, %s1519_s6 }
 0x451   :  { %v1591_v46 = vpack.c.bf16 %v1139_v19, %v1133_v43  ;;  %p1646_p8 = scmp.ne.s32.totalorder %s1519_s6, %s1645_s12  ;;  %p1651_p10 = scmp.lt.s32.totalorder %s1645_s12, %s1645_s12 }
 0x452   :  { %1590 = vmatprep.subr.bf16.mxu1 %v1589_v37  ;;  %v1454_v37 = vld [vmem:[#allocation4 + $0x10] sm:$0xff] }
 0x453   :  { %1592 = vmatpush1.bf16.msra.mxu1 %v1591_v46  ;;  %v1460_v19 = vcombine.high %v1454_v37, %v1454_v37  ;;  %p1652_p11 = por %p1651_p10, %p1650_p9 }
 0x454   :  { %1542 = vmatprep.subr.msk.mxu1 %vm410_vm10, %v1146_v16  ;;  %v1144_v49 = vld [vmem:[#allocation3 + $0xd8] sm:$0xf]  ;;  %v1145_v51 = vld [vmem:[#allocation3 + $0xe0] sm:$0xf] }
 0x455   :  { %1539 = vmatprep.subr.msk.mxu0 %vm410_vm10, %v1144_v49  ;;  %p1653_p12 = pnand %p1652_p11, %p1646_p8 }
 0x456   :  { %1540 = vmatpush1.msk.msra.mxu0 %vm410_vm10, %v1143_v50 }
 0x457   :  { %1541 = vmatmul.mubr.msk.f32.vlgmr.msra.gmra.mrb[4].mxu0 %vm2237_vm1, %v2120_v56  ;;  %1543 = vmatpush1.msk.msra.mxu1 %vm410_vm10, %v1145_v51 }
 0x458   :  { %1544 = vmatmul.mubr.msk.f32.vlgmr.msra.gmra.mrb[4].mxu1 %vm2238_vm6, %v2120_v56 }
 0x515   :  { %v2146_v52 = vpop.f32.mrb[2].mxu1 }
 0x516   :  { %v1381_v22 = vmul.f32 %v2146_v52, %v1913_v20  ;;  %v2150_v25 = vpop.f32.mrb[3].mxu1 }
 0x517   :  { %v1382_v24 = vmul.f32 %v2150_v25, %v1915_v21 }
 0x518   :  { %v1387_v28 = vsel %vm410_vm10, %v1381_v22, 0.0  ;;  %v1400_v36 = vmul.f32 %v1381_v22, %v2146_v52 }
 0x519   :  { %v1388_v42 = vsel %vm410_vm10, %v1382_v24, 0.0  ;;  %v1401_v44 = vmul.f32 %v1382_v24, %v2150_v25 }
 0x51a   :  { %v1406_v45 = vsel %vm410_vm10, %v1400_v36, 0.0  ;;  %v1389_v48 = vadd.f32 %v1388_v42, %v1387_v28 }
 0x51b   :  { %v1407_v53 = vsel %vm410_vm10, %v1401_v44, 0.0 }
 0x51c   :  { %v1408_v54 = vadd.f32 %v1407_v53, %v1406_v45 }
 0x52a   :  { %v2160_v20 = vpop.f32.mrb[4].mxu0 }
 0x52b   :  { %v1383_v29 = vmul.f32 %v2160_v20, %v1931_v38  ;;  %v2164_v21 = vpop.f32.mrb[5].mxu0  ;;  %v2166_v30 = vpop.f32.mrb[4].mxu1 }
 0x52c   :  { %v1384_v47 = vmul.f32 %v2164_v21, %v1933_v39  ;;  %v1385_v55 = vmul.f32 %v2166_v30, %v1935_v40  ;;  %v1378_v56 = vpop.f32.mrb[5].mxu1 }
 0x52d   :  { %v1390_v31 = vsel %vm410_vm10, %v1383_v29, 0.0  ;;  %v1402_v57 = vmul.f32 %v1383_v29, %v2160_v20  ;;  %v1386_v58 = vmul.f32 %v1378_v56, %v1937_v41 }
 0x52e   :  { %v1391_v59 = vadd.f32 %v1390_v31, %v1389_v48  ;;  %v1392_v38 = vsel %vm410_vm10, %v1384_v47, 0.0  ;;  %v1403_v32 = vmul.f32 %v1384_v47, %v2164_v21  ;;  %v1394_v60 = vsel %vm410_vm10, %v1385_v55, 0.0 }
 0x52f   :  { %v1409_v35 = vsel %vm410_vm10, %v1402_v57, 0.0  ;;  %v1404_v39 = vmul.f32 %v1385_v55, %v2166_v30  ;;  %v1405_v63 = vmul.f32 %v1386_v58, %v1378_v56  ;;  %v1396_v33 = vsel %vm60_vm0, %v1386_v58, 0.0 }
 0x530   :  { %v1410_v61 = vadd.f32 %v1409_v35, %v1408_v54  ;;  %v1393_v40 = vadd.f32 %v1392_v38, %v1391_v59  ;;  %v1411_v62 = vsel %vm410_vm10, %v1403_v32, 0.0 }
 0x531   :  { %v1413_v41 = vsel %vm410_vm10, %v1404_v39, 0.0  ;;  %v1415_v3 = vsel %vm60_vm0, %v1405_v63, 0.0  ;;  %vm1510_vm0 = vmor %vm100_vm8, %vm410_vm10 }
 0x532   :  { %v1412_v0 = vadd.f32 %v1411_v62, %v1410_v61  ;;  %v1395_v1 = vadd.f32 %v1394_v60, %v1393_v40 }
 0x534   :  { %v1397_v34 = vadd.f32 %v1396_v33, %v1395_v1  ;;  %v1414_v2 = vadd.f32 %v1413_v41, %v1412_v0 }
 0x536   :  { %1398 = vadd.xlane.f32.xlu1 %v1397_v34  ;;  %v1416_v4 = vadd.f32 %v1415_v3, %v1414_v2 }
 0x538   :  { %1417 = vadd.xlane.f32.xlu0 %v1416_v4 }
 0x547   :  { %1461 = vrot.lane.b32.xlu1 %v1452_v5, %s1675_s19 }
 0x54e   :  { %1463 = vrot.lane.b32.xlu0 %v1458_v9, %s1675_s19 }
 0x5c3   :  { %v1399_v6 = vpop.xlane.xlu1 %1398 }
 0x5c4   :  { %v1419_v7 = vmul.f32 0.001953125, %v1399_v6 }
 0x5c5   :  { %v1418_v8 = vpop.xlane.xlu0 %1417 }
 0x5c6   :  { %v1421_v10 = vmul.f32 %v1419_v7, %v1419_v7  ;;  %v1420_v11 = vmul.f32 0.001953125, %v1418_v8 }
 0x5c7   :  { %v1462_v16 = vpop.permute.xlu1 %1461 }
 0x5c8   :  { %v1422_v27 = vsub.f32 %v1420_v11, %v1421_v10 }
 0x5c9   :  { %v1464_v46 = vpop.permute.xlu0 %1463 }
 0x5ca   :  { %v1424_v12 = vadd.f32 1e-05, %v1422_v27  ;;  %v1473_v36 = vsel %vm201_vm4, %v1462_v16, %v1464_v46 }
 0x5cc   :  { %1621 = vrsqrt.f32 %v1424_v12 }
 0x5d6   :  { %v1622_v15 = vpop.eup %1621 }
 0x5d7   :  { %v1426_v17 = vmul.f32 %v1622_v15, %v1423_v13 }
 0x5d9   :  { %1432 = vperm.xlu0 %1606, %v1426_v17   ;;  %v1428_v23 = vmul.f32 %v1426_v17, %v1419_v7 }
 0x5db   :  { %v1429_v43 = vsub.f32 %v1427_v18, %v1428_v23 }
 0x5dd   :  { %1443 = vperm.xlu1 %1607, %v1429_v43   ;;  %1467 = vrot.lane.b32.xlu0 %v1459_v26, %s1675_s19 }
 0x5e1   :  { %1471 = vrot.lane.b32.xlu0 %v1460_v19, %s1675_s19  ;;  %1465 = vrot.lane.b32.xlu1 %v1453_v14, %s1675_s19 }
 0x5e5   :  { %1469 = vrot.lane.b32.xlu1 %v1454_v37, %s1675_s19 }
 0x658   :  { %v1433_v49 = vpop.permute.xlu0 %1432 }
 0x659   :  { %v1435_v50 = vmul.f32 %v1433_v49, %v2146_v52  ;;  %v1436_v28 = vmul.f32 %v1433_v49, %v2150_v25  ;;  %v1440_v42 = vmul.f32 %v1433_v49, %v1378_v56  ;;  %v1437_v44 = vmul.f32 %v1433_v49, %v2160_v20 }
 0x65a   :  { %v1438_v52 = vmul.f32 %v1433_v49, %v2164_v21  ;;  %v1439_v55 = vmul.f32 %v1433_v49, %v2166_v30 }
 0x65c   :  { %v1468_v51 = vpop.permute.xlu0 %1467  ;;  %v1444_v22 = vpop.permute.xlu1 %1443 }
 0x65d   :  { %v1446_v24 = vadd.f32 %v1444_v22, %v1435_v50  ;;  %v1447_v45 = vadd.f32 %v1444_v22, %v1436_v28  ;;  %v1451_v31 = vadd.f32 %v1444_v22, %v1440_v42  ;;  %v1448_v57 = vadd.f32 %v1444_v22, %v1437_v44 }
 0x65e   :  { %v1449_v58 = vadd.f32 %v1444_v22, %v1438_v52  ;;  %v1450_v59 = vadd.f32 %v1444_v22, %v1439_v55 }
 0x65f   :  { %v1484_v48 = vadd.f32 %v1473_v36, %v1446_v24 }
 0x660   :  { %v1466_v53 = vpop.permute.xlu1 %1465  ;;  %v1472_v54 = vpop.permute.xlu0 %1471 }
 0x661   :  { %v1474_v29 = vsel %vm201_vm4, %v1464_v46, %v1466_v53  ;;  %v1475_v47 = vsel %vm201_vm4, %v1466_v53, %v1468_v51  ;;  %v1489_v56 = vadd.f32 %v1472_v54, %v1451_v31  ;;  %v1490_v38 = vmax.f32 %v1484_v48, 0.0 }
 0x662   :  { %v1485_v25 = vadd.f32 %v1474_v29, %v1447_v45  ;;  %v1486_v20 = vadd.f32 %v1475_v47, %v1448_v57 }
 0x663   :  { %v1495_v21 = vmax.f32 %v1489_v56, 0.0 }
 0x664   :  { %v1491_v32 = vmax.f32 %v1485_v25, 0.0  ;;  %v1470_v35 = vpop.permute.xlu1 %1469  ;;  %v1492_v30 = vmax.f32 %v1486_v20, 0.0 }
 0x665   :  { %v1476_v60 = vsel %vm201_vm4, %v1468_v51, %v1470_v35  ;;  %v1477_v39 = vsel %vm201_vm4, %v1470_v35, %v1472_v54 }
 0x666   :  { %v1502_v61 = vcombine.low %v1490_v38, %v1491_v32  ;;  %v1487_v40 = vadd.f32 %v1476_v60, %v1449_v58  ;;  %v1488_v62 = vadd.f32 %v1477_v39, %v1450_v59 }
 0x668   :  { %1508 = vst [vmem:[#allocation7] sm:$0xff] %v1502_v61  ;;  %v1493_v63 = vmax.f32 %v1487_v40, 0.0  ;;  %v1494_v0 = vmax.f32 %v1488_v62, 0.0 }
 0x66a   :  { %v1503_v1 = vcombine.low %v1492_v30, %v1493_v63  ;;  %v1504_v41 = vcombine.low %v1494_v0, %v1495_v21 }
 0x66c   :  { %1509 = vst [vmem:[#allocation7 + $0x8] sm:$0xff] %v1503_v1  ;;  %1511 = vst.msk [vmem:[#allocation7 + $0x10] sm:$0xff] %vm1510_vm0, %v1504_v41 }
 0x66d   :  { %1656 = shalt.err (!%p1653_p12)
}
 0x66e   :  { %s1657_s15 = scalar_lea.hbm %s2228_s8, 384 }
 0x66f   :  { %p1658_p13 = scmp.ne.s32.totalorder %s2228_s8, %s1657_s15  ;;  %p1661_p0 = scmp.lt.u32.totalorder %s1657_s15, %s2228_s8 }
 0x671   :  { %p1663_p1 = pnand %p1661_p0, %p1658_p13 }
 0x673   :  { %1666 = shalt.err (!%p1663_p1)
}
 0x674   :  { %1521 = dma.vmem_to_hbm [thread:$0]  %s1519_s6, 384, %s2228_s8, [#allocation6]  }
 0x675   :  { %1669 = dma.done.wait [#allocation6], 384  }
 0x676   :  { %1670 = vsyncadd [#allocation6], 4294966912 }
 0x677   :  { %1525 = vsyncpa [#allocation5], 1 }
 0x678   :  { %1526 = vsyncpa [#allocation6], 1 }

</bundles_post_ra>
